<compile_context>
chip_gen: v7x
topology: tpu7x:2x2x1
jax: 0.10.0
libtpu: 0.0.40
codegen_flags: <defaults>
</compile_context>

<pallas_src>
import math
import functools

import jax
import jax.numpy as jnp
from jax.experimental import pallas as pl
from jax.experimental.pallas import tpu as pltpu


# --------------------------------------------------------------------------- #
# VMEM budget / tile targets (per TPU generation)                              #
# --------------------------------------------------------------------------- #

def _vmem_limit_bytes():
    cap = 64 * 1024 * 1024
    try:
        info = pltpu.get_tpu_info()
        cap = int(getattr(info, "vmem_capacity_bytes", cap))
    except Exception:
        pass
    # ~25% headroom for compiler-internal scratch; never above 96 MiB.
    return min(int(cap * 0.75), 96 * 1024 * 1024)


_VMEM_LIMIT = _vmem_limit_bytes()
_BIG_VMEM = _VMEM_LIMIT >= 64 * 1024 * 1024      # v5e/v6e (128 MiB) vs v7x (64 MiB)

_TM = 512 if _BIG_VMEM else 256                  # matmul row tile
_TN = 1024 if _BIG_VMEM else 512                 # matmul lane tile
_TF = 1024 if _BIG_VMEM else 512                 # d_ff tile (fused FFN)
_TQ = 256                                        # flash-attn q tile
_TK = 512                                        # flash-attn kv tile
_TNORM = 2048 if _BIG_VMEM else 1024             # standalone-norm row tile

_EPS = 1e-6


# --------------------------------------------------------------------------- #
# helpers                                                                      #
# --------------------------------------------------------------------------- #

def _pick_lane(dim, target):
    """Tile for a lane (last) dim: multiple of 128 dividing dim, else full dim."""
    t = (min(target, dim) // 128) * 128
    while t >= 128:
        if dim % t == 0:
            return t
        t -= 128
    return dim


def _pick_sub(dim, target):
    """Tile for a sublane dim: multiple of 8 dividing dim, else full dim."""
    t = (min(target, dim) // 8) * 8
    while t >= 8:
        if dim % t == 0:
            return t
        t -= 8
    return dim


def _pad128(a, axis):
    """Zero-pad `axis` up to the next multiple of 128."""
    pad = (-a.shape[axis]) % 128
    if pad == 0:
        return a
    widths = [(0, 0)] * a.ndim
    widths[axis] = (0, pad)
    return jnp.pad(a, widths)


def _normalize(x_f32, alpha, bias, eps):
    """alpha * (x - mean) / (std_unbiased + eps) + bias  (torch Norm semantics)."""
    d = x_f32.shape[-1]
    mean = jnp.mean(x_f32, axis=-1, keepdims=True)
    xc = x_f32 - mean
    var = jnp.sum(xc * xc, axis=-1, keepdims=True) / (d - 1)
    inv = pl.reciprocal(jnp.sqrt(var) + eps, approx=True)
    return alpha * xc * inv + bias


# --------------------------------------------------------------------------- #
# linear kernels (full-K, bf16 operands, f32 accumulate)                       #
# --------------------------------------------------------------------------- #

def _linear_kernel(x_ref, w_ref, b_ref, o_ref):
    y = jnp.dot(x_ref[...], w_ref[...], preferred_element_type=jnp.float32)
    o_ref[...] = (y + b_ref[...]).astype(o_ref.dtype)


def _linear_res_kernel(x_ref, w_ref, b_ref, r_ref, o_ref):
    y = jnp.dot(x_ref[...], w_ref[...], preferred_element_type=jnp.float32)
    y = y + b_ref[...] + r_ref[...].astype(jnp.float32)
    o_ref[...] = y.astype(o_ref.dtype)


def _norm_linear_kernel(x_ref, a_ref, nb_ref, w_ref, b_ref, o_ref, xn_ref, *, eps):
    # fused pre-norm prologue; normalized x cached in VMEM scratch at j == 0
    @pl.when(pl.program_id(1) == 0)
    def _():
        xn = _normalize(x_ref[...].astype(jnp.float32), a_ref[...], nb_ref[...], eps)
        xn_ref[...] = xn.astype(xn_ref.dtype)

    y = jnp.dot(xn_ref[...], w_ref[...], preferred_element_type=jnp.float32)
    o_ref[...] = (y + b_ref[...]).astype(o_ref.dtype)


def linear(x, w, b, residual=None, out_dtype=jnp.bfloat16):
    """y = x @ w + b [+ residual].  x:(M,K) bf16, w:(K,N) bf16, b:(N,) f32."""
    M, K = x.shape
    N = w.shape[1]
    wp = _pad128(w, 1)
    bp = _pad128(b.reshape(1, N), 1)
    Np = wp.shape[1]
    tm = _pick_sub(M, _TM)
    tn = _pick_lane(Np, _TN)

    in_specs = [
        pl.BlockSpec((tm, K), lambda i, j: (i, 0)),
        pl.BlockSpec((K, tn), lambda i, j: (0, j)),
        pl.BlockSpec((1, tn), lambda i, j: (0, j)),
    ]
    args = [x, wp, bp]
    if residual is None:
        kern = _linear_kernel
    else:
        kern = _linear_res_kernel
        in_specs.append(pl.BlockSpec((tm, tn), lambda i, j: (i, j)))
        args.append(_pad128(residual, 1))

    out = pl.pallas_call(
        kern,
        out_shape=jax.ShapeDtypeStruct((M, Np), out_dtype),
        grid_spec=pltpu.PrefetchScalarGridSpec(
            num_scalar_prefetch=0,
            grid=(M // tm, Np // tn),
            in_specs=in_specs,
            out_specs=pl.BlockSpec((tm, tn), lambda i, j: (i, j)),
        ),
        compiler_params=pltpu.CompilerParams(
            dimension_semantics=("parallel", "parallel"),
            vmem_limit_bytes=_VMEM_LIMIT),
    )(*args)
    return out if Np == N else out[:, :N]


def norm_linear(x, norm_p, w, b, out_dtype=jnp.bfloat16, eps=_EPS):
    """Fused pre-norm + linear: (alpha*(x-mu)/(std+eps)+beta) @ w + b."""
    M, K = x.shape
    N = w.shape[1]
    wp = _pad128(w, 1)
    bp = _pad128(b.reshape(1, N), 1)
    Np = wp.shape[1]
    tm = _pick_sub(M, _TM)
    tn = _pick_lane(Np, _TN)
    kern = functools.partial(_norm_linear_kernel, eps=eps)

    out = pl.pallas_call(
        kern,
        out_shape=jax.ShapeDtypeStruct((M, Np), out_dtype),
        grid_spec=pltpu.PrefetchScalarGridSpec(
            num_scalar_prefetch=0,
            grid=(M // tm, Np // tn),
            in_specs=[
                pl.BlockSpec((tm, K), lambda i, j: (i, 0)),
                pl.BlockSpec((1, K), lambda i, j: (0, 0)),
                pl.BlockSpec((1, K), lambda i, j: (0, 0)),
                pl.BlockSpec((K, tn), lambda i, j: (0, j)),
                pl.BlockSpec((1, tn), lambda i, j: (0, j)),
            ],
            out_specs=pl.BlockSpec((tm, tn), lambda i, j: (i, j)),
            scratch_shapes=[pltpu.VMEM((tm, K), jnp.bfloat16)],
        ),
        compiler_params=pltpu.CompilerParams(
            # j sequential: normalized-x scratch is filled at j == 0.
            dimension_semantics=("parallel", "arbitrary"),
            vmem_limit_bytes=_VMEM_LIMIT),
    )(x, norm_p["a"].reshape(1, K), norm_p["b"].reshape(1, K), wp, bp)
    return out if Np == N else out[:, :N]


# --------------------------------------------------------------------------- #
# fused feed-forward: norm -> W1+b1 -> ReLU -> W2+b2 -> +residual              #
# --------------------------------------------------------------------------- #

def _ffn_kernel(x_ref, a_ref, nb_ref, w1_ref, b1_ref, w2_ref, b2_ref, r_ref,
                o_ref, acc_ref, xn_ref, *, eps):
    j = pl.program_id(1)

    @pl.when(j == 0)
    def _():
        acc_ref[...] = jnp.zeros_like(acc_ref)
        xn = _normalize(x_ref[...].astype(jnp.float32), a_ref[...], nb_ref[...], eps)
        xn_ref[...] = xn.astype(xn_ref.dtype)

    h = jnp.dot(xn_ref[...], w1_ref[...], preferred_element_type=jnp.float32)
    h = jnp.maximum(h + b1_ref[...], 0.0)
    acc_ref[...] += jnp.dot(h.astype(w2_ref.dtype), w2_ref[...],
                            preferred_element_type=jnp.float32)

    @pl.when(j == pl.num_programs(1) - 1)
    def _():
        y = acc_ref[...] + b2_ref[...] + r_ref[...].astype(jnp.float32)
        o_ref[...] = y.astype(o_ref.dtype)


def feed_forward(x, ffp, norm_p, eps=_EPS):
    """x + FF(norm(x)); hidden activation never leaves VMEM."""
    B, S, D = x.shape
    M = B * S
    x2d = x.reshape(M, D)
    w1 = _pad128(ffp["w1"], 1)
    b1 = _pad128(ffp["b1"].reshape(1, -1), 1)
    w2 = _pad128(ffp["w2"], 0)
    b2 = ffp["b2"].reshape(1, D)
    F = w1.shape[1]
    tm = _pick_sub(M, _TM)
    tf = _pick_lane(F, _TF)
    kern = functools.partial(_ffn_kernel, eps=eps)

    out = pl.pallas_call(
        kern,
        out_shape=jax.ShapeDtypeStruct((M, D), jnp.bfloat16),
        grid_spec=pltpu.PrefetchScalarGridSpec(
            num_scalar_prefetch=0,
            grid=(M // tm, F // tf),
            in_specs=[
                pl.BlockSpec((tm, D), lambda i, j: (i, 0)),   # x (pre-norm input)
                pl.BlockSpec((1, D), lambda i, j: (0, 0)),    # norm alpha
                pl.BlockSpec((1, D), lambda i, j: (0, 0)),    # norm bias
                pl.BlockSpec((D, tf), lambda i, j: (0, j)),   # W1
                pl.BlockSpec((1, tf), lambda i, j: (0, j)),   # b1
                pl.BlockSpec((tf, D), lambda i, j: (j, 0)),   # W2
                pl.BlockSpec((1, D), lambda i, j: (0, 0)),    # b2
                pl.BlockSpec((tm, D), lambda i, j: (i, 0)),   # residual
            ],
            out_specs=pl.BlockSpec((tm, D), lambda i, j: (i, 0)),
            scratch_shapes=[pltpu.VMEM((tm, D), jnp.float32),
                            pltpu.VMEM((tm, D), jnp.bfloat16)],
        ),
        compiler_params=pltpu.CompilerParams(
            dimension_semantics=("parallel", "arbitrary"),
            vmem_limit_bytes=_VMEM_LIMIT),
    )(x2d, norm_p["a"].reshape(1, D), norm_p["b"].reshape(1, D),
      w1, b1, w2, b2, x2d)
    return out.reshape(B, S, D)


# --------------------------------------------------------------------------- #
# standalone Norm (encoder output only)                                        #
# --------------------------------------------------------------------------- #

def _norm_kernel(x_ref, a_ref, b_ref, o_ref, *, eps):
    y = _normalize(x_ref[...].astype(jnp.float32), a_ref[...], b_ref[...], eps)
    o_ref[...] = y.astype(o_ref.dtype)


def norm(x, norm_p, eps=_EPS, out_dtype=jnp.bfloat16):
    B, S, D = x.shape
    M = B * S
    tm = _pick_sub(M, _TNORM)
    kern = functools.partial(_norm_kernel, eps=eps)
    out = pl.pallas_call(
        kern,
        out_shape=jax.ShapeDtypeStruct((M, D), out_dtype),
        grid=(M // tm,),
        in_specs=[
            pl.BlockSpec((tm, D), lambda i: (i, 0)),
            pl.BlockSpec((1, D), lambda i: (0, 0)),
            pl.BlockSpec((1, D), lambda i: (0, 0)),
        ],
        out_specs=pl.BlockSpec((tm, D), lambda i: (i, 0)),
        compiler_params=pltpu.CompilerParams(
            dimension_semantics=("parallel",),
            vmem_limit_bytes=_VMEM_LIMIT),
    )(x.reshape(M, D), norm_p["a"].reshape(1, D), norm_p["b"].reshape(1, D))
    return out.reshape(B, S, D)


# --------------------------------------------------------------------------- #
# flash attention (online softmax, KV-tiled, heads as a grid axis)             #
# --------------------------------------------------------------------------- #

def _flash_kernel(bias_ref, q_ref, k_ref, v_ref, o_ref, m_ref, l_ref, acc_ref,
                  *, scale):
    ki = pl.program_id(3)

    @pl.when(ki == 0)
    def _():
        m_ref[...] = jnp.full_like(m_ref, -jnp.inf)
        l_ref[...] = jnp.zeros_like(l_ref)
        acc_ref[...] = jnp.zeros_like(acc_ref)

    q = q_ref[0, 0]                               # (tq, dk) bf16
    k = k_ref[0, 0]                               # (tk, dk) bf16
    v = v_ref[0, 0]                               # (tk, dk) bf16
    s = jax.lax.dot_general(q, k, (((1,), (1,)), ((), ())),
                            preferred_element_type=jnp.float32) * scale
    s = s + bias_ref[0]                           # additive mask bias (0 / -1e9)

    m_prev = m_ref[...]
    m_new = jnp.maximum(m_prev, jnp.max(s, axis=-1, keepdims=True))
    alpha = jnp.exp(m_prev - m_new)
    p = jnp.exp(s - m_new)
    l_ref[...] = alpha * l_ref[...] + jnp.sum(p, axis=-1, keepdims=True)
    acc_ref[...] = alpha * acc_ref[...] + jnp.dot(
        p.astype(v.dtype), v, preferred_element_type=jnp.float32)
    m_ref[...] = m_new

    @pl.when(ki == pl.num_programs(3) - 1)
    def _():
        o_ref[0, 0] = (acc_ref[...] *
                       pl.reciprocal(l_ref[...], approx=True)).astype(o_ref.dtype)


def flash_attention(q, k, v, bias):
    """q,k,v: (B, H, S, dk) bf16; bias: (B, Sm, Sk) f32 additive (-1e9 = masked)."""
    B, H, Sq, dk = q.shape
    Sk = k.shape[2]
    Sm = bias.shape[1]
    tq = _pick_sub(Sq, _TQ)
    tk = _pick_lane(Sk, _TK)
    smb = 1 if Sm == 1 else tq
    scale = 1.0 / math.sqrt(dk)
    kern = functools.partial(_flash_kernel, scale=scale)

    if Sm == 1:
        bias_map = lambda b, h, qi, ki: (b, 0, ki)
    else:
        bias_map = lambda b, h, qi, ki: (b, qi, ki)

    return pl.pallas_call(
        kern,
        out_shape=jax.ShapeDtypeStruct((B, H, Sq, dk), jnp.bfloat16),
        grid_spec=pltpu.PrefetchScalarGridSpec(
            num_scalar_prefetch=0,
            grid=(B, H, Sq // tq, Sk // tk),
            in_specs=[
                pl.BlockSpec((1, smb, tk), bias_map),
                pl.BlockSpec((1, 1, tq, dk), lambda b, h, qi, ki: (b, h, qi, 0)),
                pl.BlockSpec((1, 1, tk, dk), lambda b, h, qi, ki: (b, h, ki, 0)),
                pl.BlockSpec((1, 1, tk, dk), lambda b, h, qi, ki: (b, h, ki, 0)),
            ],
            out_specs=pl.BlockSpec((1, 1, tq, dk),
                                   lambda b, h, qi, ki: (b, h, qi, 0)),
            scratch_shapes=[pltpu.VMEM((tq, 1), jnp.float32),
                            pltpu.VMEM((tq, 1), jnp.float32),
                            pltpu.VMEM((tq, dk), jnp.float32)],
        ),
        compiler_params=pltpu.CompilerParams(
            dimension_semantics=("parallel", "parallel", "parallel", "arbitrary"),
            vmem_limit_bytes=_VMEM_LIMIT),
    )(bias, q, k, v)


# --------------------------------------------------------------------------- #
# model pieces (XLA glue: embedding, PE, head split/merge)                     #
# --------------------------------------------------------------------------- #

def positional_encoding(seq_len, d_model):
    pos = jnp.arange(seq_len, dtype=jnp.float32)[:, None]
    i = jnp.arange(0, d_model, 2, dtype=jnp.float32)
    pe_sin = jnp.sin(pos / jnp.power(10000.0, (2.0 * i) / d_model))
    pe_cos = jnp.cos(pos / jnp.power(10000.0, (2.0 * (i + 1.0)) / d_model))
    return jnp.stack([pe_sin, pe_cos], axis=-1).reshape(seq_len, d_model)


def embed_pe(tokens, emb_table, d_model):
    # Embedder + PositionalEncoder (dropout is identity in eval mode).
    x = emb_table[tokens] * math.sqrt(d_model)
    S = tokens.shape[1]
    x = x + positional_encoding(S, d_model)[None]
    return x.astype(jnp.bfloat16)


def _split_heads(x, heads):
    B, S, D = x.shape
    return jnp.transpose(x.reshape(B, S, heads, D // heads), (0, 2, 1, 3))


def _merge_heads(x):
    B, H, S, dk = x.shape
    return jnp.transpose(x, (0, 2, 1, 3)).reshape(B, S, H * dk)


def self_mha(x, bias, attn_p, norm_p, heads):
    """pre-norm -> fused QKV proj -> flash attention -> out proj (+residual)."""
    B, S, D = x.shape
    M = B * S
    x2d = x.reshape(M, D)
    qkv = norm_linear(x2d, norm_p, attn_p["qkv"]["w"], attn_p["qkv"]["b"])
    qkv = qkv.reshape(B, S, 3, heads, D // heads)
    q = jnp.transpose(qkv[:, :, 0], (0, 2, 1, 3))
    k = jnp.transpose(qkv[:, :, 1], (0, 2, 1, 3))
    v = jnp.transpose(qkv[:, :, 2], (0, 2, 1, 3))
    o = _merge_heads(flash_attention(q, k, v, bias)).reshape(M, D)
    out = linear(o, attn_p["o"]["w"], attn_p["o"]["b"], residual=x2d)
    return out.reshape(B, S, D)


def cross_mha(x, mem, bias, attn_p, norm_p, heads):
    """pre-norm(Q) -> fused KV proj of encoder memory -> flash attn -> out proj."""
    B, Sq, D = x.shape
    Sk = mem.shape[1]
    x2d = x.reshape(B * Sq, D)
    q = norm_linear(x2d, norm_p, attn_p["q"]["w"], attn_p["q"]["b"])
    kv = linear(mem.reshape(B * Sk, D), attn_p["kv"]["w"], attn_p["kv"]["b"])
    q = _split_heads(q.reshape(B, Sq, D), heads)
    kv = kv.reshape(B, Sk, 2, heads, D // heads)
    k = jnp.transpose(kv[:, :, 0], (0, 2, 1, 3))
    v = jnp.transpose(kv[:, :, 1], (0, 2, 1, 3))
    o = _merge_heads(flash_attention(q, k, v, bias)).reshape(B * Sq, D)
    out = linear(o, attn_p["o"]["w"], attn_p["o"]["b"], residual=x2d)
    return out.reshape(B, Sq, D)


def encoder_layer(x, bias, p, heads):
    x = self_mha(x, bias, p["attn"], p["n1"], heads)
    x = feed_forward(x, p["ff"], p["n2"])
    return x


def decoder_layer(x, e_outputs, src_bias, trg_bias, p, heads):
    x = self_mha(x, trg_bias, p["attn1"], p["n1"], heads)
    x = cross_mha(x, e_outputs, src_bias, p["attn2"], p["n2"], heads)
    x = feed_forward(x, p["ff"], p["n3"])
    return x


def encoder_fwd(p, src, src_bias, heads, d_model):
    x = embed_pe(src, p["embed"], d_model)
    for lp in p["layers"]:
        x = encoder_layer(x, src_bias, lp, heads)
    return norm(x, p["norm"])


def decoder_fwd(p, trg, e_outputs, src_bias, trg_bias, heads, d_model):
    x = embed_pe(trg, p["embed"], d_model)
    for lp in p["layers"]:
        x = decoder_layer(x, e_outputs, src_bias, trg_bias, lp, heads)
    return x            # final decoder norm is fused into the vocab projection


@functools.partial(jax.jit, static_argnames=("heads", "d_model"))
def transformer_forward(params, src, trg, src_mask, trg_mask, *, heads, d_model):
    # masks -> additive biases, computed once (not per head / per tile)
    src_bias = jnp.where(src_mask == 0.0, jnp.float32(-1e9), jnp.float32(0.0))
    trg_bias = jnp.where(trg_mask == 0.0, jnp.float32(-1e9), jnp.float32(0.0))

    e_outputs = encoder_fwd(params["encoder"], src, src_bias, heads, d_model)
    d_output = decoder_fwd(params["decoder"], trg, e_outputs, src_bias, trg_bias,
                           heads, d_model)
    B, St, D = d_output.shape
    # decoder final norm fused into the output (vocab) projection; logits in f32
    logits = norm_linear(d_output.reshape(B * St, D), params["decoder"]["norm"],
                         params["out"]["w"], params["out"]["b"],
                         out_dtype=jnp.float32)
    return logits.reshape(B, St, -1)


# --------------------------------------------------------------------------- #
# parameter init (weights bf16, biases / norm params f32)                      #
# --------------------------------------------------------------------------- #

def _init_linear(key, d_in, d_out, scale=0.02):
    kw, kb = jax.random.split(key)
    return {"w": (scale * jax.random.normal(kw, (d_in, d_out), jnp.float32)
                  ).astype(jnp.bfloat16),
            "b": scale * jax.random.normal(kb, (d_out,), jnp.float32)}


def _init_norm(d_model):
    return {"a": jnp.ones((d_model,), jnp.float32),
            "b": jnp.zeros((d_model,), jnp.float32)}


def _init_self_attn(key, d_model):
    k1, k2 = jax.random.split(key)
    return {"qkv": _init_linear(k1, d_model, 3 * d_model),   # fused Q|K|V
            "o": _init_linear(k2, d_model, d_model)}


def _init_cross_attn(key, d_model):
    k1, k2, k3 = jax.random.split(key, 3)
    return {"q": _init_linear(k1, d_model, d_model),
            "kv": _init_linear(k2, d_model, 2 * d_model),    # fused K|V
            "o": _init_linear(k3, d_model, d_model)}


def _init_ff(key, d_model, d_ff):
    k1, k2 = jax.random.split(key)
    l1 = _init_linear(k1, d_model, d_ff)
    l2 = _init_linear(k2, d_ff, d_model)
    return {"w1": l1["w"], "b1": l1["b"], "w2": l2["w"], "b2": l2["b"]}


def _init_encoder_layer(key, d_model, d_ff):
    k1, k2 = jax.random.split(key)
    return {"n1": _init_norm(d_model), "n2": _init_norm(d_model),
            "attn": _init_self_attn(k1, d_model),
            "ff": _init_ff(k2, d_model, d_ff)}


def _init_decoder_layer(key, d_model, d_ff):
    k1, k2, k3 = jax.random.split(key, 3)
    return {"n1": _init_norm(d_model), "n2": _init_norm(d_model),
            "n3": _init_norm(d_model),
            "attn1": _init_self_attn(k1, d_model),
            "attn2": _init_cross_attn(k2, d_model),
            "ff": _init_ff(k3, d_model, d_ff)}


def init_transformer(key, src_vocab, trg_vocab, d_model, N, heads, d_ff):
    # TODO(synk): Embedder's `is_encoder` flag semantics are unknown upstream;
    # treated as a plain nn.Embedding lookup here.
    ke, kd, ko, kee, kde = jax.random.split(key, 5)
    enc = {"embed": 0.02 * jax.random.normal(kee, (src_vocab, d_model), jnp.float32),
           "layers": [_init_encoder_layer(k, d_model, d_ff)
                      for k in jax.random.split(ke, N)],
           "norm": _init_norm(d_model)}
    dec = {"embed": 0.02 * jax.random.normal(kde, (trg_vocab, d_model), jnp.float32),
           "layers": [_init_decoder_layer(k, d_model, d_ff)
                      for k in jax.random.split(kd, N)],
           "norm": _init_norm(d_model)}
    return {"encoder": enc, "decoder": dec,
            "out": _init_linear(ko, d_model, trg_vocab)}


# --------------------------------------------------------------------------- #
# main                                                                         #
# --------------------------------------------------------------------------- #

if __name__ == "__main__":
    B, S_src, S_trg = 2, 8, 8
    d_model, N, heads, d_ff = 32, 2, 4, 64
    src_vocab, trg_vocab = 50, 50

    root = jax.random.PRNGKey(0)
    kp, ks, kt = jax.random.split(root, 3)

    params = init_transformer(kp, src_vocab, trg_vocab, d_model, N, heads, d_ff)

    src = jax.random.randint(ks, (B, S_src), 0, src_vocab, dtype=jnp.int32)
    trg = jax.random.randint(kt, (B, S_trg), 0, trg_vocab, dtype=jnp.int32)
    src_mask = jnp.ones((B, 1, S_src), jnp.float32)                 # all visible
    trg_mask = jnp.tril(jnp.ones((S_trg, S_trg), jnp.float32))[None]
    trg_mask = jnp.broadcast_to(trg_mask, (B, S_trg, S_trg))        # causal

    # TODO(synk): the autoregressive `prediction` / beam-search method is a
    # host-side decoding loop and is not part of the forward pass implemented here.
    out = transformer_forward(params, src, trg, src_mask, trg_mask,
                              heads=heads, d_model=d_model)
    jax.block_until_ready(out)
    assert out.shape == (B, S_trg, trg_vocab), out.shape
    assert bool(jnp.all(jnp.isfinite(out)))
    print("KERNEL_OK")
</pallas_src>

<mosaic_0001>
module attributes {stable_mosaic.version = 11 : i64} {
  func.func @_norm_linear_kernel(%arg0: i32, %arg1: i32, %arg2: memref<16x32xbf16, #tpu.memory_space<vmem>>, %arg3: memref<1x32xf32, #tpu.memory_space<vmem>>, %arg4: memref<1x32xf32, #tpu.memory_space<vmem>>, %arg5: memref<32x128xbf16, #tpu.memory_space<vmem>>, %arg6: memref<1x128xf32, #tpu.memory_space<vmem>>, %arg7: memref<16x128xbf16, #tpu.memory_space<vmem>>, %arg8: memref<16x32xbf16, #tpu.memory_space<vmem>>) attributes {dimension_semantics = [#tpu.dimension_semantics<parallel>, #tpu.dimension_semantics<arbitrary>], iteration_bounds = array<i64: 1, 1>, scalar_prefetch = 0 : i64, scratch_operands = 1 : i64, tpu.core_type = #tpu.core_type<tc>, window_params = [{transform_indices = @transform_0, window_bounds = array<i64: 16, 32>}, {pipeline_mode = #tpu.pipeline_mode<synchronous>, transform_indices = @transform_1, window_bounds = array<i64: 1, 32>}, {pipeline_mode = #tpu.pipeline_mode<synchronous>, transform_indices = @transform_2, window_bounds = array<i64: 1, 32>}, {transform_indices = @transform_3, window_bounds = array<i64: 32, 128>}, {transform_indices = @transform_4, window_bounds = array<i64: 1, 128>}, {transform_indices = @transform_5, window_bounds = array<i64: 16, 128>}]} {
    %c0_i32 = arith.constant 0 : i32
    %0 = arith.cmpi eq, %arg1, %c0_i32 : i32
    %1 = arith.extui %0 : i1 to i32
    %c0_i32_0 = arith.constant 0 : i32
    %2 = arith.cmpi ne, %1, %c0_i32_0 : i32
    scf.if %2 {
      %c0_8 = arith.constant 0 : index
      %c0_9 = arith.constant 0 : index
      %11 = vector.load %arg2[%c0_8, %c0_9] : memref<16x32xbf16, #tpu.memory_space<vmem>>, vector<16x32xbf16>
      %12 = arith.extf %11 : vector<16x32xbf16> to vector<16x32xf32>
      %c0_10 = arith.constant 0 : index
      %c0_11 = arith.constant 0 : index
      %13 = vector.load %arg3[%c0_10, %c0_11] : memref<1x32xf32, #tpu.memory_space<vmem>>, vector<1x32xf32>
      %c0_12 = arith.constant 0 : index
      %c0_13 = arith.constant 0 : index
      %14 = vector.load %arg4[%c0_12, %c0_13] : memref<1x32xf32, #tpu.memory_space<vmem>>, vector<1x32xf32>
      %cst_14 = arith.constant dense<0.000000e+00> : vector<16xf32>
      %15 = vector.multi_reduction <add>, %12, %cst_14 [1] : vector<16x32xf32> to vector<16xf32>
      %16 = vector.shape_cast %15 : vector<16xf32> to vector<16x1xf32>
      %cst_15 = arith.constant 3.200000e+01 : f32
      %17 = vector.broadcast %cst_15 : f32 to vector<16x1xf32>
      %18 = arith.divf %16, %17 : vector<16x1xf32>
      %19 = vector.broadcast %18 : vector<16x1xf32> to vector<16x32xf32>
      %20 = arith.subf %12, %19 : vector<16x32xf32>
      %21 = arith.mulf %20, %20 : vector<16x32xf32>
      %cst_16 = arith.constant dense<0.000000e+00> : vector<16xf32>
      %22 = vector.multi_reduction <add>, %21, %cst_16 [1] : vector<16x32xf32> to vector<16xf32>
      %23 = vector.shape_cast %22 : vector<16xf32> to vector<16x1xf32>
      %cst_17 = arith.constant 3.100000e+01 : f32
      %24 = vector.broadcast %cst_17 : f32 to vector<16x1xf32>
      %25 = arith.divf %23, %24 : vector<16x1xf32>
      %26 = math.sqrt %25 : vector<16x1xf32>
      %cst_18 = arith.constant 9.99999997E-7 : f32
      %27 = vector.broadcast %cst_18 : f32 to vector<16x1xf32>
      %28 = arith.addf %26, %27 : vector<16x1xf32>
      %29 = tpu.reciprocal %28 {approx = true} : vector<16x1xf32> -> vector<16x1xf32>
      %30 = vector.broadcast %13 : vector<1x32xf32> to vector<16x32xf32>
      %31 = arith.mulf %30, %20 : vector<16x32xf32>
      %32 = vector.broadcast %29 : vector<16x1xf32> to vector<16x32xf32>
      %33 = arith.mulf %31, %32 : vector<16x32xf32>
      %34 = vector.broadcast %14 : vector<1x32xf32> to vector<16x32xf32>
      %35 = arith.addf %33, %34 : vector<16x32xf32>
      %36 = arith.truncf %35 : vector<16x32xf32> to vector<16x32xbf16>
      %c0_19 = arith.constant 0 : index
      %c0_20 = arith.constant 0 : index
      %37 = vector.load %arg8[%c0_19, %c0_20] : memref<16x32xbf16, #tpu.memory_space<vmem>>, vector<16x32xbf16>
      tpu.vector_store %arg8[%c0_19, %c0_20], %36 {strides = array<i32>} : memref<16x32xbf16, #tpu.memory_space<vmem>>, vector<16x32xbf16>,
    } else {
    }
    %c0 = arith.constant 0 : index
    %c0_1 = arith.constant 0 : index
    %3 = vector.load %arg8[%c0, %c0_1] : memref<16x32xbf16, #tpu.memory_space<vmem>>, vector<16x32xbf16>
    %c0_2 = arith.constant 0 : index
    %c0_3 = arith.constant 0 : index
    %4 = vector.load %arg5[%c0_2, %c0_3] : memref<32x128xbf16, #tpu.memory_space<vmem>>, vector<32x128xbf16>
    %cst = arith.constant dense<0.000000e+00> : vector<16x128xf32>
    %5 = tpu.matmul %3, %4, %cst {dimension_numbers = #tpu.dot_dimension_numbers<[1], [0], [0], [1], [0, 0, 1, 1], [], []>} : vector<16x32xbf16>, vector<32x128xbf16>, vector<16x128xf32> -> vector<16x128xf32>
    %c0_4 = arith.constant 0 : index
    %c0_5 = arith.constant 0 : index
    %6 = vector.load %arg6[%c0_4, %c0_5] : memref<1x128xf32, #tpu.memory_space<vmem>>, vector<1x128xf32>
    %7 = vector.broadcast %6 : vector<1x128xf32> to vector<16x128xf32>
    %8 = arith.addf %5, %7 : vector<16x128xf32>
    %9 = arith.truncf %8 : vector<16x128xf32> to vector<16x128xbf16>
    %c0_6 = arith.constant 0 : index
    %c0_7 = arith.constant 0 : index
    %10 = vector.load %arg7[%c0_6, %c0_7] : memref<16x128xbf16, #tpu.memory_space<vmem>>, vector<16x128xbf16>
    tpu.vector_store %arg7[%c0_6, %c0_7], %9 {strides = array<i32>} : memref<16x128xbf16, #tpu.memory_space<vmem>>, vector<16x128xbf16>,
    return
  }
  func.func @transform_0(%arg0: i32, %arg1: i32) -> (i32, i32) {
    %c0_i32 = arith.constant 0 : i32
    %c0_i32_0 = arith.constant 0 : i32
    return %arg0, %c0_i32 : i32, i32
  }
  func.func @transform_1(%arg0: i32, %arg1: i32) -> (i32, i32) {
    %c0_i32 = arith.constant 0 : i32
    %c0_i32_0 = arith.constant 0 : i32
    %c0_i32_1 = arith.constant 0 : i32
    return %c0_i32, %c0_i32_0 : i32, i32
  }
  func.func @transform_2(%arg0: i32, %arg1: i32) -> (i32, i32) {
    %c0_i32 = arith.constant 0 : i32
    %c0_i32_0 = arith.constant 0 : i32
    %c0_i32_1 = arith.constant 0 : i32
    return %c0_i32, %c0_i32_0 : i32, i32
  }
  func.func @transform_3(%arg0: i32, %arg1: i32) -> (i32, i32) {
    %c0_i32 = arith.constant 0 : i32
    %c0_i32_0 = arith.constant 0 : i32
    return %c0_i32, %arg1 : i32, i32
  }
  func.func @transform_4(%arg0: i32, %arg1: i32) -> (i32, i32) {
    %c0_i32 = arith.constant 0 : i32
    %c0_i32_0 = arith.constant 0 : i32
    return %c0_i32, %arg1 : i32, i32
  }
  func.func @transform_5(%arg0: i32, %arg1: i32) -> (i32, i32) {
    %c0_i32 = arith.constant 0 : i32
    return %arg0, %arg1 : i32, i32
  }
}

module attributes {stable_mosaic.version = 11 : i64} {
  func.func @_flash_kernel(%arg0: i32, %arg1: i32, %arg2: i32, %arg3: i32, %arg4: memref<1x8x8xf32, #tpu.memory_space<vmem>>, %arg5: memref<1x1x8x8xbf16, #tpu.memory_space<vmem>>, %arg6: memref<1x1x8x8xbf16, #tpu.memory_space<vmem>>, %arg7: memref<1x1x8x8xbf16, #tpu.memory_space<vmem>>, %arg8: memref<1x1x8x8xbf16, #tpu.memory_space<vmem>>, %arg9: memref<8x1xf32, #tpu.memory_space<vmem>>, %arg10: memref<8x1xf32, #tpu.memory_space<vmem>>, %arg11: memref<8x8xf32, #tpu.memory_space<vmem>>) attributes {dimension_semantics = [#tpu.dimension_semantics<parallel>, #tpu.dimension_semantics<parallel>, #tpu.dimension_semantics<parallel>, #tpu.dimension_semantics<arbitrary>], iteration_bounds = array<i64: 2, 4, 1, 1>, scalar_prefetch = 0 : i64, scratch_operands = 3 : i64, tpu.core_type = #tpu.core_type<tc>, window_params = [{transform_indices = @transform_0, window_bounds = array<i64: 1, 8, 8>}, {transform_indices = @transform_1, window_bounds = array<i64: 1, 1, 8, 8>}, {transform_indices = @transform_2, window_bounds = array<i64: 1, 1, 8, 8>}, {transform_indices = @transform_3, window_bounds = array<i64: 1, 1, 8, 8>}, {transform_indices = @transform_4, window_bounds = array<i64: 1, 1, 8, 8>}]} {
    %c0_i32 = arith.constant 0 : i32
    %0 = arith.cmpi eq, %arg3, %c0_i32 : i32
    %1 = arith.extui %0 : i1 to i32
    %c0_i32_0 = arith.constant 0 : i32
    %2 = arith.cmpi ne, %1, %c0_i32_0 : i32
    scf.if %2 {
      %cst_33 = arith.constant 0xFF800000 : f32
      %41 = vector.broadcast %cst_33 : f32 to vector<8x1xf32>
      %c0_34 = arith.constant 0 : index
      %c0_35 = arith.constant 0 : index
      %42 = vector.load %arg9[%c0_34, %c0_35] : memref<8x1xf32, #tpu.memory_space<vmem>>, vector<8x1xf32>
      tpu.vector_store %arg9[%c0_34, %c0_35], %41 {strides = array<i32>} : memref<8x1xf32, #tpu.memory_space<vmem>>, vector<8x1xf32>,
      %cst_36 = arith.constant 0.000000e+00 : f32
      %43 = vector.broadcast %cst_36 : f32 to vector<8x1xf32>
      %c0_37 = arith.constant 0 : index
      %c0_38 = arith.constant 0 : index
      %44 = vector.load %arg10[%c0_37, %c0_38] : memref<8x1xf32, #tpu.memory_space<vmem>>, vector<8x1xf32>
      tpu.vector_store %arg10[%c0_37, %c0_38], %43 {strides = array<i32>} : memref<8x1xf32, #tpu.memory_space<vmem>>, vector<8x1xf32>,
      %cst_39 = arith.constant 0.000000e+00 : f32
      %45 = vector.broadcast %cst_39 : f32 to vector<8x8xf32>
      %c0_40 = arith.constant 0 : index
      %c0_41 = arith.constant 0 : index
      %46 = vector.load %arg11[%c0_40, %c0_41] : memref<8x8xf32, #tpu.memory_space<vmem>>, vector<8x8xf32>
      tpu.vector_store %arg11[%c0_40, %c0_41], %45 {strides = array<i32>} : memref<8x8xf32, #tpu.memory_space<vmem>>, vector<8x8xf32>,
    } else {
    }
    %c0 = arith.constant 0 : index
    %c0_1 = arith.constant 0 : index
    %c0_2 = arith.constant 0 : index
    %c0_3 = arith.constant 0 : index
    %3 = vector.load %arg5[%c0, %c0_1, %c0_2, %c0_3] : memref<1x1x8x8xbf16, #tpu.memory_space<vmem>>, vector<1x1x8x8xbf16>
    %4 = vector.shape_cast %3 : vector<1x1x8x8xbf16> to vector<8x8xbf16>
    %c0_4 = arith.constant 0 : index
    %c0_5 = arith.constant 0 : index
    %c0_6 = arith.constant 0 : index
    %c0_7 = arith.constant 0 : index
    %5 = vector.load %arg6[%c0_4, %c0_5, %c0_6, %c0_7] : memref<1x1x8x8xbf16, #tpu.memory_space<vmem>>, vector<1x1x8x8xbf16>
    %6 = vector.shape_cast %5 : vector<1x1x8x8xbf16> to vector<8x8xbf16>
    %c0_8 = arith.constant 0 : index
    %c0_9 = arith.constant 0 : index
    %c0_10 = arith.constant 0 : index
    %c0_11 = arith.constant 0 : index
    %7 = vector.load %arg7[%c0_8, %c0_9, %c0_10, %c0_11] : memref<1x1x8x8xbf16, #tpu.memory_space<vmem>>, vector<1x1x8x8xbf16>
    %8 = vector.shape_cast %7 : vector<1x1x8x8xbf16> to vector<8x8xbf16>
    %cst = arith.constant dense<0.000000e+00> : vector<8x8xf32>
    %9 = tpu.matmul %4, %6, %cst {dimension_numbers = #tpu.dot_dimension_numbers<[1], [1], [0], [0], [0, 0, 1, 0], [], []>} : vector<8x8xbf16>, vector<8x8xbf16>, vector<8x8xf32> -> vector<8x8xf32>
    %cst_12 = arith.constant 0.353553385 : f32
    %10 = vector.broadcast %cst_12 : f32 to vector<8x8xf32>
    %11 = arith.mulf %9, %10 : vector<8x8xf32>
    %c0_13 = arith.constant 0 : index
    %c0_14 = arith.constant 0 : index
    %c0_15 = arith.constant 0 : index
    %12 = vector.load %arg4[%c0_13, %c0_14, %c0_15] : memref<1x8x8xf32, #tpu.memory_space<vmem>>, vector<1x8x8xf32>
    %13 = vector.shape_cast %12 : vector<1x8x8xf32> to vector<8x8xf32>
    %14 = arith.addf %11, %13 : vector<8x8xf32>
    %c0_16 = arith.constant 0 : index
    %c0_17 = arith.constant 0 : index
    %15 = vector.load %arg9[%c0_16, %c0_17] : memref<8x1xf32, #tpu.memory_space<vmem>>, vector<8x1xf32>
    %cst_18 = arith.constant dense<0xFF800000> : vector<8xf32>
    %16 = vector.multi_reduction <maximumf>, %14, %cst_18 [1] : vector<8x8xf32> to vector<8xf32>
    %17 = vector.shape_cast %16 : vector<8xf32> to vector<8x1xf32>
    %18 = arith.maximumf %15, %17 : vector<8x1xf32>
    %19 = arith.subf %15, %18 : vector<8x1xf32>
    %20 = math.exp %19 : vector<8x1xf32>
    %21 = vector.broadcast %18 : vector<8x1xf32> to vector<8x8xf32>
    %22 = arith.subf %14, %21 : vector<8x8xf32>
    %23 = math.exp %22 : vector<8x8xf32>
    %c0_19 = arith.constant 0 : index
    %c0_20 = arith.constant 0 : index
    %24 = vector.load %arg10[%c0_19, %c0_20] : memref<8x1xf32, #tpu.memory_space<vmem>>, vector<8x1xf32>
    %25 = arith.mulf %20, %24 : vector<8x1xf32>
    %cst_21 = arith.constant dense<0.000000e+00> : vector<8xf32>
    %26 = vector.multi_reduction <add>, %23, %cst_21 [1] : vector<8x8xf32> to vector<8xf32>
    %27 = vector.shape_cast %26 : vector<8xf32> to vector<8x1xf32>
    %28 = arith.addf %25, %27 : vector<8x1xf32>
    %c0_22 = arith.constant 0 : index
    %c0_23 = arith.constant 0 : index
    %29 = vector.load %arg10[%c0_22, %c0_23] : memref<8x1xf32, #tpu.memory_space<vmem>>, vector<8x1xf32>
    tpu.vector_store %arg10[%c0_22, %c0_23], %28 {strides = array<i32>} : memref<8x1xf32, #tpu.memory_space<vmem>>, vector<8x1xf32>,
    %c0_24 = arith.constant 0 : index
    %c0_25 = arith.constant 0 : index
    %30 = vector.load %arg11[%c0_24, %c0_25] : memref<8x8xf32, #tpu.memory_space<vmem>>, vector<8x8xf32>
    %31 = vector.broadcast %20 : vector<8x1xf32> to vector<8x8xf32>
    %32 = arith.mulf %31, %30 : vector<8x8xf32>
    %33 = arith.truncf %23 : vector<8x8xf32> to vector<8x8xbf16>
    %cst_26 = arith.constant dense<0.000000e+00> : vector<8x8xf32>
    %34 = tpu.matmul %33, %8, %cst_26 {dimension_numbers = #tpu.dot_dimension_numbers<[1], [0], [0], [1], [0, 0, 1, 1], [], []>} : vector<8x8xbf16>, vector<8x8xbf16>, vector<8x8xf32> -> vector<8x8xf32>
    %35 = arith.addf %32, %34 : vector<8x8xf32>
    %c0_27 = arith.constant 0 : index
    %c0_28 = arith.constant 0 : index
    %36 = vector.load %arg11[%c0_27, %c0_28] : memref<8x8xf32, #tpu.memory_space<vmem>>, vector<8x8xf32>
    tpu.vector_store %arg11[%c0_27, %c0_28], %35 {strides = array<i32>} : memref<8x8xf32, #tpu.memory_space<vmem>>, vector<8x8xf32>,
    %c0_29 = arith.constant 0 : index
    %c0_30 = arith.constant 0 : index
    %37 = vector.load %arg9[%c0_29, %c0_30] : memref<8x1xf32, #tpu.memory_space<vmem>>, vector<8x1xf32>
    tpu.vector_store %arg9[%c0_29, %c0_30], %18 {strides = array<i32>} : memref<8x1xf32, #tpu.memory_space<vmem>>, vector<8x1xf32>,
    %c0_i32_31 = arith.constant 0 : i32
    %38 = arith.cmpi eq, %arg3, %c0_i32_31 : i32
    %39 = arith.extui %38 : i1 to i32
    %c0_i32_32 = arith.constant 0 : i32
    %40 = arith.cmpi ne, %39, %c0_i32_32 : i32
    scf.if %40 {
      %c0_33 = arith.constant 0 : index
      %c0_34 = arith.constant 0 : index
      %41 = vector.load %arg11[%c0_33, %c0_34] : memref<8x8xf32, #tpu.memory_space<vmem>>, vector<8x8xf32>
      %c0_35 = arith.constant 0 : index
      %c0_36 = arith.constant 0 : index
      %42 = vector.load %arg10[%c0_35, %c0_36] : memref<8x1xf32, #tpu.memory_space<vmem>>, vector<8x1xf32>
      %43 = tpu.reciprocal %42 {approx = true} : vector<8x1xf32> -> vector<8x1xf32>
      %44 = vector.broadcast %43 : vector<8x1xf32> to vector<8x8xf32>
      %45 = arith.mulf %41, %44 : vector<8x8xf32>
      %46 = arith.truncf %45 : vector<8x8xf32> to vector<8x8xbf16>
      %c0_37 = arith.constant 0 : index
      %c0_38 = arith.constant 0 : index
      %c0_39 = arith.constant 0 : index
      %c0_40 = arith.constant 0 : index
      %47 = vector.load %arg8[%c0_37, %c0_38, %c0_39, %c0_40] : memref<1x1x8x8xbf16, #tpu.memory_space<vmem>>, vector<1x1x8x8xbf16>
      %48 = vector.shape_cast %47 : vector<1x1x8x8xbf16> to vector<8x8xbf16>
      %49 = vector.shape_cast %46 : vector<8x8xbf16> to vector<1x1x8x8xbf16>
      tpu.vector_store %arg8[%c0_37, %c0_38, %c0_39, %c0_40], %49 {strides = array<i32>} : memref<1x1x8x8xbf16, #tpu.memory_space<vmem>>, vector<1x1x8x8xbf16>,
    } else {
    }
    return
  }
  func.func @transform_0(%arg0: i32, %arg1: i32, %arg2: i32, %arg3: i32) -> (i32, i32, i32) {
    %c0_i32 = arith.constant 0 : i32
    return %arg0, %arg2, %arg3 : i32, i32, i32
  }
  func.func @transform_1(%arg0: i32, %arg1: i32, %arg2: i32, %arg3: i32) -> (i32, i32, i32, i32) {
    %c0_i32 = arith.constant 0 : i32
    %c0_i32_0 = arith.constant 0 : i32
    return %arg0, %arg1, %arg2, %c0_i32 : i32, i32, i32, i32
  }
  func.func @transform_2(%arg0: i32, %arg1: i32, %arg2: i32, %arg3: i32) -> (i32, i32, i32, i32) {
    %c0_i32 = arith.constant 0 : i32
    %c0_i32_0 = arith.constant 0 : i32
    return %arg0, %arg1, %arg3, %c0_i32 : i32, i32, i32, i32
  }
  func.func @transform_3(%arg0: i32, %arg1: i32, %arg2: i32, %arg3: i32) -> (i32, i32, i32, i32) {
    %c0_i32 = arith.constant 0 : i32
    %c0_i32_0 = arith.constant 0 : i32
    return %arg0, %arg1, %arg3, %c0_i32 : i32, i32, i32, i32
  }
  func.func @transform_4(%arg0: i32, %arg1: i32, %arg2: i32, %arg3: i32) -> (i32, i32, i32, i32) {
    %c0_i32 = arith.constant 0 : i32
    %c0_i32_0 = arith.constant 0 : i32
    return %arg0, %arg1, %arg2, %c0_i32 : i32, i32, i32, i32
  }
}

module attributes {stable_mosaic.version = 11 : i64} {
  func.func @_linear_res_kernel(%arg0: i32, %arg1: i32, %arg2: memref<16x32xbf16, #tpu.memory_space<vmem>>, %arg3: memref<32x128xbf16, #tpu.memory_space<vmem>>, %arg4: memref<1x128xf32, #tpu.memory_space<vmem>>, %arg5: memref<16x128xbf16, #tpu.memory_space<vmem>>, %arg6: memref<16x128xbf16, #tpu.memory_space<vmem>>) attributes {dimension_semantics = [#tpu.dimension_semantics<parallel>, #tpu.dimension_semantics<parallel>], iteration_bounds = array<i64: 1, 1>, scalar_prefetch = 0 : i64, scratch_operands = 0 : i64, tpu.core_type = #tpu.core_type<tc>, window_params = [{transform_indices = @transform_0, window_bounds = array<i64: 16, 32>}, {transform_indices = @transform_1, window_bounds = array<i64: 32, 128>}, {transform_indices = @transform_2, window_bounds = array<i64: 1, 128>}, {transform_indices = @transform_3, window_bounds = array<i64: 16, 128>}, {transform_indices = @transform_4, window_bounds = array<i64: 16, 128>}]} {
    %c0 = arith.constant 0 : index
    %c0_0 = arith.constant 0 : index
    %0 = vector.load %arg2[%c0, %c0_0] : memref<16x32xbf16, #tpu.memory_space<vmem>>, vector<16x32xbf16>
    %c0_1 = arith.constant 0 : index
    %c0_2 = arith.constant 0 : index
    %1 = vector.load %arg3[%c0_1, %c0_2] : memref<32x128xbf16, #tpu.memory_space<vmem>>, vector<32x128xbf16>
    %cst = arith.constant dense<0.000000e+00> : vector<16x128xf32>
    %2 = tpu.matmul %0, %1, %cst {dimension_numbers = #tpu.dot_dimension_numbers<[1], [0], [0], [1], [0, 0, 1, 1], [], []>} : vector<16x32xbf16>, vector<32x128xbf16>, vector<16x128xf32> -> vector<16x128xf32>
    %c0_3 = arith.constant 0 : index
    %c0_4 = arith.constant 0 : index
    %3 = vector.load %arg4[%c0_3, %c0_4] : memref<1x128xf32, #tpu.memory_space<vmem>>, vector<1x128xf32>
    %4 = vector.broadcast %3 : vector<1x128xf32> to vector<16x128xf32>
    %5 = arith.addf %2, %4 : vector<16x128xf32>
    %c0_5 = arith.constant 0 : index
    %c0_6 = arith.constant 0 : index
    %6 = vector.load %arg5[%c0_5, %c0_6] : memref<16x128xbf16, #tpu.memory_space<vmem>>, vector<16x128xbf16>
    %7 = arith.extf %6 : vector<16x128xbf16> to vector<16x128xf32>
    %8 = arith.addf %5, %7 : vector<16x128xf32>
    %9 = arith.truncf %8 : vector<16x128xf32> to vector<16x128xbf16>
    %c0_7 = arith.constant 0 : index
    %c0_8 = arith.constant 0 : index
    %10 = vector.load %arg6[%c0_7, %c0_8] : memref<16x128xbf16, #tpu.memory_space<vmem>>, vector<16x128xbf16>
    tpu.vector_store %arg6[%c0_7, %c0_8], %9 {strides = array<i32>} : memref<16x128xbf16, #tpu.memory_space<vmem>>, vector<16x128xbf16>,
    return
  }
  func.func @transform_0(%arg0: i32, %arg1: i32) -> (i32, i32) {
    %c0_i32 = arith.constant 0 : i32
    %c0_i32_0 = arith.constant 0 : i32
    return %arg0, %c0_i32 : i32, i32
  }
  func.func @transform_1(%arg0: i32, %arg1: i32) -> (i32, i32) {
    %c0_i32 = arith.constant 0 : i32
    %c0_i32_0 = arith.constant 0 : i32
    return %c0_i32, %arg1 : i32, i32
  }
  func.func @transform_2(%arg0: i32, %arg1: i32) -> (i32, i32) {
    %c0_i32 = arith.constant 0 : i32
    %c0_i32_0 = arith.constant 0 : i32
    return %c0_i32, %arg1 : i32, i32
  }
  func.func @transform_3(%arg0: i32, %arg1: i32) -> (i32, i32) {
    %c0_i32 = arith.constant 0 : i32
    return %arg0, %arg1 : i32, i32
  }
  func.func @transform_4(%arg0: i32, %arg1: i32) -> (i32, i32) {
    %c0_i32 = arith.constant 0 : i32
    return %arg0, %arg1 : i32, i32
  }
}

module attributes {stable_mosaic.version = 11 : i64} {
  func.func @_flash_kernel(%arg0: i32, %arg1: i32, %arg2: i32, %arg3: i32, %arg4: memref<1x1x8xf32, #tpu.memory_space<vmem>>, %arg5: memref<1x1x8x8xbf16, #tpu.memory_space<vmem>>, %arg6: memref<1x1x8x8xbf16, #tpu.memory_space<vmem>>, %arg7: memref<1x1x8x8xbf16, #tpu.memory_space<vmem>>, %arg8: memref<1x1x8x8xbf16, #tpu.memory_space<vmem>>, %arg9: memref<8x1xf32, #tpu.memory_space<vmem>>, %arg10: memref<8x1xf32, #tpu.memory_space<vmem>>, %arg11: memref<8x8xf32, #tpu.memory_space<vmem>>) attributes {dimension_semantics = [#tpu.dimension_semantics<parallel>, #tpu.dimension_semantics<parallel>, #tpu.dimension_semantics<parallel>, #tpu.dimension_semantics<arbitrary>], iteration_bounds = array<i64: 2, 4, 1, 1>, scalar_prefetch = 0 : i64, scratch_operands = 3 : i64, tpu.core_type = #tpu.core_type<tc>, window_params = [{transform_indices = @transform_0, window_bounds = array<i64: 1, 1, 8>}, {transform_indices = @transform_1, window_bounds = array<i64: 1, 1, 8, 8>}, {transform_indices = @transform_2, window_bounds = array<i64: 1, 1, 8, 8>}, {transform_indices = @transform_3, window_bounds = array<i64: 1, 1, 8, 8>}, {transform_indices = @transform_4, window_bounds = array<i64: 1, 1, 8, 8>}]} {
    %c0_i32 = arith.constant 0 : i32
    %0 = arith.cmpi eq, %arg3, %c0_i32 : i32
    %1 = arith.extui %0 : i1 to i32
    %c0_i32_0 = arith.constant 0 : i32
    %2 = arith.cmpi ne, %1, %c0_i32_0 : i32
    scf.if %2 {
      %cst_33 = arith.constant 0xFF800000 : f32
      %42 = vector.broadcast %cst_33 : f32 to vector<8x1xf32>
      %c0_34 = arith.constant 0 : index
      %c0_35 = arith.constant 0 : index
      %43 = vector.load %arg9[%c0_34, %c0_35] : memref<8x1xf32, #tpu.memory_space<vmem>>, vector<8x1xf32>
      tpu.vector_store %arg9[%c0_34, %c0_35], %42 {strides = array<i32>} : memref<8x1xf32, #tpu.memory_space<vmem>>, vector<8x1xf32>,
      %cst_36 = arith.constant 0.000000e+00 : f32
      %44 = vector.broadcast %cst_36 : f32 to vector<8x1xf32>
      %c0_37 = arith.constant 0 : index
      %c0_38 = arith.constant 0 : index
      %45 = vector.load %arg10[%c0_37, %c0_38] : memref<8x1xf32, #tpu.memory_space<vmem>>, vector<8x1xf32>
      tpu.vector_store %arg10[%c0_37, %c0_38], %44 {strides = array<i32>} : memref<8x1xf32, #tpu.memory_space<vmem>>, vector<8x1xf32>,
      %cst_39 = arith.constant 0.000000e+00 : f32
      %46 = vector.broadcast %cst_39 : f32 to vector<8x8xf32>
      %c0_40 = arith.constant 0 : index
      %c0_41 = arith.constant 0 : index
      %47 = vector.load %arg11[%c0_40, %c0_41] : memref<8x8xf32, #tpu.memory_space<vmem>>, vector<8x8xf32>
      tpu.vector_store %arg11[%c0_40, %c0_41], %46 {strides = array<i32>} : memref<8x8xf32, #tpu.memory_space<vmem>>, vector<8x8xf32>,
    } else {
    }
    %c0 = arith.constant 0 : index
    %c0_1 = arith.constant 0 : index
    %c0_2 = arith.constant 0 : index
    %c0_3 = arith.constant 0 : index
    %3 = vector.load %arg5[%c0, %c0_1, %c0_2, %c0_3] : memref<1x1x8x8xbf16, #tpu.memory_space<vmem>>, vector<1x1x8x8xbf16>
    %4 = vector.shape_cast %3 : vector<1x1x8x8xbf16> to vector<8x8xbf16>
    %c0_4 = arith.constant 0 : index
    %c0_5 = arith.constant 0 : index
    %c0_6 = arith.constant 0 : index
    %c0_7 = arith.constant 0 : index
    %5 = vector.load %arg6[%c0_4, %c0_5, %c0_6, %c0_7] : memref<1x1x8x8xbf16, #tpu.memory_space<vmem>>, vector<1x1x8x8xbf16>
    %6 = vector.shape_cast %5 : vector<1x1x8x8xbf16> to vector<8x8xbf16>
    %c0_8 = arith.constant 0 : index
    %c0_9 = arith.constant 0 : index
    %c0_10 = arith.constant 0 : index
    %c0_11 = arith.constant 0 : index
    %7 = vector.load %arg7[%c0_8, %c0_9, %c0_10, %c0_11] : memref<1x1x8x8xbf16, #tpu.memory_space<vmem>>, vector<1x1x8x8xbf16>
    %8 = vector.shape_cast %7 : vector<1x1x8x8xbf16> to vector<8x8xbf16>
    %cst = arith.constant dense<0.000000e+00> : vector<8x8xf32>
    %9 = tpu.matmul %4, %6, %cst {dimension_numbers = #tpu.dot_dimension_numbers<[1], [1], [0], [0], [0, 0, 1, 0], [], []>} : vector<8x8xbf16>, vector<8x8xbf16>, vector<8x8xf32> -> vector<8x8xf32>
    %cst_12 = arith.constant 0.353553385 : f32
    %10 = vector.broadcast %cst_12 : f32 to vector<8x8xf32>
    %11 = arith.mulf %9, %10 : vector<8x8xf32>
    %c0_13 = arith.constant 0 : index
    %c0_14 = arith.constant 0 : index
    %c0_15 = arith.constant 0 : index
    %12 = vector.load %arg4[%c0_13, %c0_14, %c0_15] : memref<1x1x8xf32, #tpu.memory_space<vmem>>, vector<1x1x8xf32>
    %13 = vector.shape_cast %12 : vector<1x1x8xf32> to vector<1x8xf32>
    %14 = vector.broadcast %13 : vector<1x8xf32> to vector<8x8xf32>
    %15 = arith.addf %11, %14 : vector<8x8xf32>
    %c0_16 = arith.constant 0 : index
    %c0_17 = arith.constant 0 : index
    %16 = vector.load %arg9[%c0_16, %c0_17] : memref<8x1xf32, #tpu.memory_space<vmem>>, vector<8x1xf32>
    %cst_18 = arith.constant dense<0xFF800000> : vector<8xf32>
    %17 = vector.multi_reduction <maximumf>, %15, %cst_18 [1] : vector<8x8xf32> to vector<8xf32>
    %18 = vector.shape_cast %17 : vector<8xf32> to vector<8x1xf32>
    %19 = arith.maximumf %16, %18 : vector<8x1xf32>
    %20 = arith.subf %16, %19 : vector<8x1xf32>
    %21 = math.exp %20 : vector<8x1xf32>
    %22 = vector.broadcast %19 : vector<8x1xf32> to vector<8x8xf32>
    %23 = arith.subf %15, %22 : vector<8x8xf32>
    %24 = math.exp %23 : vector<8x8xf32>
    %c0_19 = arith.constant 0 : index
    %c0_20 = arith.constant 0 : index
    %25 = vector.load %arg10[%c0_19, %c0_20] : memref<8x1xf32, #tpu.memory_space<vmem>>, vector<8x1xf32>
    %26 = arith.mulf %21, %25 : vector<8x1xf32>
    %cst_21 = arith.constant dense<0.000000e+00> : vector<8xf32>
    %27 = vector.multi_reduction <add>, %24, %cst_21 [1] : vector<8x8xf32> to vector<8xf32>
    %28 = vector.shape_cast %27 : vector<8xf32> to vector<8x1xf32>
    %29 = arith.addf %26, %28 : vector<8x1xf32>
    %c0_22 = arith.constant 0 : index
    %c0_23 = arith.constant 0 : index
    %30 = vector.load %arg10[%c0_22, %c0_23] : memref<8x1xf32, #tpu.memory_space<vmem>>, vector<8x1xf32>
    tpu.vector_store %arg10[%c0_22, %c0_23], %29 {strides = array<i32>} : memref<8x1xf32, #tpu.memory_space<vmem>>, vector<8x1xf32>,
    %c0_24 = arith.constant 0 : index
    %c0_25 = arith.constant 0 : index
    %31 = vector.load %arg11[%c0_24, %c0_25] : memref<8x8xf32, #tpu.memory_space<vmem>>, vector<8x8xf32>
    %32 = vector.broadcast %21 : vector<8x1xf32> to vector<8x8xf32>
    %33 = arith.mulf %32, %31 : vector<8x8xf32>
    %34 = arith.truncf %24 : vector<8x8xf32> to vector<8x8xbf16>
    %cst_26 = arith.constant dense<0.000000e+00> : vector<8x8xf32>
    %35 = tpu.matmul %34, %8, %cst_26 {dimension_numbers = #tpu.dot_dimension_numbers<[1], [0], [0], [1], [0, 0, 1, 1], [], []>} : vector<8x8xbf16>, vector<8x8xbf16>, vector<8x8xf32> -> vector<8x8xf32>
    %36 = arith.addf %33, %35 : vector<8x8xf32>
    %c0_27 = arith.constant 0 : index
    %c0_28 = arith.constant 0 : index
    %37 = vector.load %arg11[%c0_27, %c0_28] : memref<8x8xf32, #tpu.memory_space<vmem>>, vector<8x8xf32>
    tpu.vector_store %arg11[%c0_27, %c0_28], %36 {strides = array<i32>} : memref<8x8xf32, #tpu.memory_space<vmem>>, vector<8x8xf32>,
    %c0_29 = arith.constant 0 : index
    %c0_30 = arith.constant 0 : index
    %38 = vector.load %arg9[%c0_29, %c0_30] : memref<8x1xf32, #tpu.memory_space<vmem>>, vector<8x1xf32>
    tpu.vector_store %arg9[%c0_29, %c0_30], %19 {strides = array<i32>} : memref<8x1xf32, #tpu.memory_space<vmem>>, vector<8x1xf32>,
    %c0_i32_31 = arith.constant 0 : i32
    %39 = arith.cmpi eq, %arg3, %c0_i32_31 : i32
    %40 = arith.extui %39 : i1 to i32
    %c0_i32_32 = arith.constant 0 : i32
    %41 = arith.cmpi ne, %40, %c0_i32_32 : i32
    scf.if %41 {
      %c0_33 = arith.constant 0 : index
      %c0_34 = arith.constant 0 : index
      %42 = vector.load %arg11[%c0_33, %c0_34] : memref<8x8xf32, #tpu.memory_space<vmem>>, vector<8x8xf32>
      %c0_35 = arith.constant 0 : index
      %c0_36 = arith.constant 0 : index
      %43 = vector.load %arg10[%c0_35, %c0_36] : memref<8x1xf32, #tpu.memory_space<vmem>>, vector<8x1xf32>
      %44 = tpu.reciprocal %43 {approx = true} : vector<8x1xf32> -> vector<8x1xf32>
      %45 = vector.broadcast %44 : vector<8x1xf32> to vector<8x8xf32>
      %46 = arith.mulf %42, %45 : vector<8x8xf32>
      %47 = arith.truncf %46 : vector<8x8xf32> to vector<8x8xbf16>
      %c0_37 = arith.constant 0 : index
      %c0_38 = arith.constant 0 : index
      %c0_39 = arith.constant 0 : index
      %c0_40 = arith.constant 0 : index
      %48 = vector.load %arg8[%c0_37, %c0_38, %c0_39, %c0_40] : memref<1x1x8x8xbf16, #tpu.memory_space<vmem>>, vector<1x1x8x8xbf16>
      %49 = vector.shape_cast %48 : vector<1x1x8x8xbf16> to vector<8x8xbf16>
      %50 = vector.shape_cast %47 : vector<8x8xbf16> to vector<1x1x8x8xbf16>
      tpu.vector_store %arg8[%c0_37, %c0_38, %c0_39, %c0_40], %50 {strides = array<i32>} : memref<1x1x8x8xbf16, #tpu.memory_space<vmem>>, vector<1x1x8x8xbf16>,
    } else {
    }
    return
  }
  func.func @transform_0(%arg0: i32, %arg1: i32, %arg2: i32, %arg3: i32) -> (i32, i32, i32) {
    %c0_i32 = arith.constant 0 : i32
    %c0_i32_0 = arith.constant 0 : i32
    return %arg0, %c0_i32, %arg3 : i32, i32, i32
  }
  func.func @transform_1(%arg0: i32, %arg1: i32, %arg2: i32, %arg3: i32) -> (i32, i32, i32, i32) {
    %c0_i32 = arith.constant 0 : i32
    %c0_i32_0 = arith.constant 0 : i32
    return %arg0, %arg1, %arg2, %c0_i32 : i32, i32, i32, i32
  }
  func.func @transform_2(%arg0: i32, %arg1: i32, %arg2: i32, %arg3: i32) -> (i32, i32, i32, i32) {
    %c0_i32 = arith.constant 0 : i32
    %c0_i32_0 = arith.constant 0 : i32
    return %arg0, %arg1, %arg3, %c0_i32 : i32, i32, i32, i32
  }
  func.func @transform_3(%arg0: i32, %arg1: i32, %arg2: i32, %arg3: i32) -> (i32, i32, i32, i32) {
    %c0_i32 = arith.constant 0 : i32
    %c0_i32_0 = arith.constant 0 : i32
    return %arg0, %arg1, %arg3, %c0_i32 : i32, i32, i32, i32
  }
  func.func @transform_4(%arg0: i32, %arg1: i32, %arg2: i32, %arg3: i32) -> (i32, i32, i32, i32) {
    %c0_i32 = arith.constant 0 : i32
    %c0_i32_0 = arith.constant 0 : i32
    return %arg0, %arg1, %arg2, %c0_i32 : i32, i32, i32, i32
  }
}

module attributes {stable_mosaic.version = 11 : i64} {
  func.func @_norm_kernel(%arg0: i32, %arg1: memref<16x32xbf16, #tpu.memory_space<vmem>>, %arg2: memref<1x32xf32, #tpu.memory_space<vmem>>, %arg3: memref<1x32xf32, #tpu.memory_space<vmem>>, %arg4: memref<16x32xbf16, #tpu.memory_space<vmem>>) attributes {dimension_semantics = [#tpu.dimension_semantics<parallel>], iteration_bounds = array<i64: 1>, scalar_prefetch = 0 : i64, scratch_operands = 0 : i64, tpu.core_type = #tpu.core_type<tc>, window_params = [{transform_indices = @transform_0, window_bounds = array<i64: 16, 32>}, {pipeline_mode = #tpu.pipeline_mode<synchronous>, transform_indices = @transform_1, window_bounds = array<i64: 1, 32>}, {pipeline_mode = #tpu.pipeline_mode<synchronous>, transform_indices = @transform_2, window_bounds = array<i64: 1, 32>}, {transform_indices = @transform_3, window_bounds = array<i64: 16, 32>}]} {
    %c0 = arith.constant 0 : index
    %c0_0 = arith.constant 0 : index
    %0 = vector.load %arg1[%c0, %c0_0] : memref<16x32xbf16, #tpu.memory_space<vmem>>, vector<16x32xbf16>
    %1 = arith.extf %0 : vector<16x32xbf16> to vector<16x32xf32>
    %c0_1 = arith.constant 0 : index
    %c0_2 = arith.constant 0 : index
    %2 = vector.load %arg2[%c0_1, %c0_2] : memref<1x32xf32, #tpu.memory_space<vmem>>, vector<1x32xf32>
    %c0_3 = arith.constant 0 : index
    %c0_4 = arith.constant 0 : index
    %3 = vector.load %arg3[%c0_3, %c0_4] : memref<1x32xf32, #tpu.memory_space<vmem>>, vector<1x32xf32>
    %cst = arith.constant dense<0.000000e+00> : vector<16xf32>
    %4 = vector.multi_reduction <add>, %1, %cst [1] : vector<16x32xf32> to vector<16xf32>
    %5 = vector.shape_cast %4 : vector<16xf32> to vector<16x1xf32>
    %cst_5 = arith.constant 3.200000e+01 : f32
    %6 = vector.broadcast %cst_5 : f32 to vector<16x1xf32>
    %7 = arith.divf %5, %6 : vector<16x1xf32>
    %8 = vector.broadcast %7 : vector<16x1xf32> to vector<16x32xf32>
    %9 = arith.subf %1, %8 : vector<16x32xf32>
    %10 = arith.mulf %9, %9 : vector<16x32xf32>
    %cst_6 = arith.constant dense<0.000000e+00> : vector<16xf32>
    %11 = vector.multi_reduction <add>, %10, %cst_6 [1] : vector<16x32xf32> to vector<16xf32>
    %12 = vector.shape_cast %11 : vector<16xf32> to vector<16x1xf32>
    %cst_7 = arith.constant 3.100000e+01 : f32
    %13 = vector.broadcast %cst_7 : f32 to vector<16x1xf32>
    %14 = arith.divf %12, %13 : vector<16x1xf32>
    %15 = math.sqrt %14 : vector<16x1xf32>
    %cst_8 = arith.constant 9.99999997E-7 : f32
    %16 = vector.broadcast %cst_8 : f32 to vector<16x1xf32>
    %17 = arith.addf %15, %16 : vector<16x1xf32>
    %18 = tpu.reciprocal %17 {approx = true} : vector<16x1xf32> -> vector<16x1xf32>
    %19 = vector.broadcast %2 : vector<1x32xf32> to vector<16x32xf32>
    %20 = arith.mulf %19, %9 : vector<16x32xf32>
    %21 = vector.broadcast %18 : vector<16x1xf32> to vector<16x32xf32>
    %22 = arith.mulf %20, %21 : vector<16x32xf32>
    %23 = vector.broadcast %3 : vector<1x32xf32> to vector<16x32xf32>
    %24 = arith.addf %22, %23 : vector<16x32xf32>
    %25 = arith.truncf %24 : vector<16x32xf32> to vector<16x32xbf16>
    %c0_9 = arith.constant 0 : index
    %c0_10 = arith.constant 0 : index
    %26 = vector.load %arg4[%c0_9, %c0_10] : memref<16x32xbf16, #tpu.memory_space<vmem>>, vector<16x32xbf16>
    tpu.vector_store %arg4[%c0_9, %c0_10], %25 {strides = array<i32>} : memref<16x32xbf16, #tpu.memory_space<vmem>>, vector<16x32xbf16>,
    return
  }
  func.func @transform_0(%arg0: i32) -> (i32, i32) {
    %c0_i32 = arith.constant 0 : i32
    %c0_i32_0 = arith.constant 0 : i32
    return %arg0, %c0_i32 : i32, i32
  }
  func.func @transform_1(%arg0: i32) -> (i32, i32) {
    %c0_i32 = arith.constant 0 : i32
    %c0_i32_0 = arith.constant 0 : i32
    %c0_i32_1 = arith.constant 0 : i32
    return %c0_i32, %c0_i32_0 : i32, i32
  }
  func.func @transform_2(%arg0: i32) -> (i32, i32) {
    %c0_i32 = arith.constant 0 : i32
    %c0_i32_0 = arith.constant 0 : i32
    %c0_i32_1 = arith.constant 0 : i32
    return %c0_i32, %c0_i32_0 : i32, i32
  }
  func.func @transform_3(%arg0: i32) -> (i32, i32) {
    %c0_i32 = arith.constant 0 : i32
    %c0_i32_0 = arith.constant 0 : i32
    return %arg0, %c0_i32 : i32, i32
  }
}

module attributes {stable_mosaic.version = 11 : i64} {
  func.func @_ffn_kernel(%arg0: i32, %arg1: i32, %arg2: memref<16x32xbf16, #tpu.memory_space<vmem>>, %arg3: memref<1x32xf32, #tpu.memory_space<vmem>>, %arg4: memref<1x32xf32, #tpu.memory_space<vmem>>, %arg5: memref<32x128xbf16, #tpu.memory_space<vmem>>, %arg6: memref<1x128xf32, #tpu.memory_space<vmem>>, %arg7: memref<128x32xbf16, #tpu.memory_space<vmem>>, %arg8: memref<1x32xf32, #tpu.memory_space<vmem>>, %arg9: memref<16x32xbf16, #tpu.memory_space<vmem>>, %arg10: memref<16x32xbf16, #tpu.memory_space<vmem>>, %arg11: memref<16x32xf32, #tpu.memory_space<vmem>>, %arg12: memref<16x32xbf16, #tpu.memory_space<vmem>>) attributes {dimension_semantics = [#tpu.dimension_semantics<parallel>, #tpu.dimension_semantics<arbitrary>], iteration_bounds = array<i64: 1, 1>, scalar_prefetch = 0 : i64, scratch_operands = 2 : i64, tpu.core_type = #tpu.core_type<tc>, window_params = [{transform_indices = @transform_0, window_bounds = array<i64: 16, 32>}, {pipeline_mode = #tpu.pipeline_mode<synchronous>, transform_indices = @transform_1, window_bounds = array<i64: 1, 32>}, {pipeline_mode = #tpu.pipeline_mode<synchronous>, transform_indices = @transform_2, window_bounds = array<i64: 1, 32>}, {transform_indices = @transform_3, window_bounds = array<i64: 32, 128>}, {transform_indices = @transform_4, window_bounds = array<i64: 1, 128>}, {transform_indices = @transform_5, window_bounds = array<i64: 128, 32>}, {pipeline_mode = #tpu.pipeline_mode<synchronous>, transform_indices = @transform_6, window_bounds = array<i64: 1, 32>}, {transform_indices = @transform_7, window_bounds = array<i64: 16, 32>}, {transform_indices = @transform_8, window_bounds = array<i64: 16, 32>}]} {
    %c0_i32 = arith.constant 0 : i32
    %0 = arith.cmpi eq, %arg1, %c0_i32 : i32
    %1 = arith.extui %0 : i1 to i32
    %c0_i32_0 = arith.constant 0 : i32
    %2 = arith.cmpi ne, %1, %c0_i32_0 : i32
    scf.if %2 {
      %cst_16 = arith.constant 0.000000e+00 : f32
      %20 = vector.broadcast %cst_16 : f32 to vector<16x32xf32>
      %c0_17 = arith.constant 0 : index
      %c0_18 = arith.constant 0 : index
      %21 = vector.load %arg11[%c0_17, %c0_18] : memref<16x32xf32, #tpu.memory_space<vmem>>, vector<16x32xf32>
      tpu.vector_store %arg11[%c0_17, %c0_18], %20 {strides = array<i32>} : memref<16x32xf32, #tpu.memory_space<vmem>>, vector<16x32xf32>,
      %c0_19 = arith.constant 0 : index
      %c0_20 = arith.constant 0 : index
      %22 = vector.load %arg2[%c0_19, %c0_20] : memref<16x32xbf16, #tpu.memory_space<vmem>>, vector<16x32xbf16>
      %23 = arith.extf %22 : vector<16x32xbf16> to vector<16x32xf32>
      %c0_21 = arith.constant 0 : index
      %c0_22 = arith.constant 0 : index
      %24 = vector.load %arg3[%c0_21, %c0_22] : memref<1x32xf32, #tpu.memory_space<vmem>>, vector<1x32xf32>
      %c0_23 = arith.constant 0 : index
      %c0_24 = arith.constant 0 : index
      %25 = vector.load %arg4[%c0_23, %c0_24] : memref<1x32xf32, #tpu.memory_space<vmem>>, vector<1x32xf32>
      %cst_25 = arith.constant dense<0.000000e+00> : vector<16xf32>
      %26 = vector.multi_reduction <add>, %23, %cst_25 [1] : vector<16x32xf32> to vector<16xf32>
      %27 = vector.shape_cast %26 : vector<16xf32> to vector<16x1xf32>
      %cst_26 = arith.constant 3.200000e+01 : f32
      %28 = vector.broadcast %cst_26 : f32 to vector<16x1xf32>
      %29 = arith.divf %27, %28 : vector<16x1xf32>
      %30 = vector.broadcast %29 : vector<16x1xf32> to vector<16x32xf32>
      %31 = arith.subf %23, %30 : vector<16x32xf32>
      %32 = arith.mulf %31, %31 : vector<16x32xf32>
      %cst_27 = arith.constant dense<0.000000e+00> : vector<16xf32>
      %33 = vector.multi_reduction <add>, %32, %cst_27 [1] : vector<16x32xf32> to vector<16xf32>
      %34 = vector.shape_cast %33 : vector<16xf32> to vector<16x1xf32>
      %cst_28 = arith.constant 3.100000e+01 : f32
      %35 = vector.broadcast %cst_28 : f32 to vector<16x1xf32>
      %36 = arith.divf %34, %35 : vector<16x1xf32>
      %37 = math.sqrt %36 : vector<16x1xf32>
      %cst_29 = arith.constant 9.99999997E-7 : f32
      %38 = vector.broadcast %cst_29 : f32 to vector<16x1xf32>
      %39 = arith.addf %37, %38 : vector<16x1xf32>
      %40 = tpu.reciprocal %39 {approx = true} : vector<16x1xf32> -> vector<16x1xf32>
      %41 = vector.broadcast %24 : vector<1x32xf32> to vector<16x32xf32>
      %42 = arith.mulf %41, %31 : vector<16x32xf32>
      %43 = vector.broadcast %40 : vector<16x1xf32> to vector<16x32xf32>
      %44 = arith.mulf %42, %43 : vector<16x32xf32>
      %45 = vector.broadcast %25 : vector<1x32xf32> to vector<16x32xf32>
      %46 = arith.addf %44, %45 : vector<16x32xf32>
      %47 = arith.truncf %46 : vector<16x32xf32> to vector<16x32xbf16>
      %c0_30 = arith.constant 0 : index
      %c0_31 = arith.constant 0 : index
      %48 = vector.load %arg12[%c0_30, %c0_31] : memref<16x32xbf16, #tpu.memory_space<vmem>>, vector<16x32xbf16>
      tpu.vector_store %arg12[%c0_30, %c0_31], %47 {strides = array<i32>} : memref<16x32xbf16, #tpu.memory_space<vmem>>, vector<16x32xbf16>,
    } else {
    }
    %c0 = arith.constant 0 : index
    %c0_1 = arith.constant 0 : index
    %3 = vector.load %arg12[%c0, %c0_1] : memref<16x32xbf16, #tpu.memory_space<vmem>>, vector<16x32xbf16>
    %c0_2 = arith.constant 0 : index
    %c0_3 = arith.constant 0 : index
    %4 = vector.load %arg5[%c0_2, %c0_3] : memref<32x128xbf16, #tpu.memory_space<vmem>>, vector<32x128xbf16>
    %cst = arith.constant dense<0.000000e+00> : vector<16x128xf32>
    %5 = tpu.matmul %3, %4, %cst {dimension_numbers = #tpu.dot_dimension_numbers<[1], [0], [0], [1], [0, 0, 1, 1], [], []>} : vector<16x32xbf16>, vector<32x128xbf16>, vector<16x128xf32> -> vector<16x128xf32>
    %c0_4 = arith.constant 0 : index
    %c0_5 = arith.constant 0 : index
    %6 = vector.load %arg6[%c0_4, %c0_5] : memref<1x128xf32, #tpu.memory_space<vmem>>, vector<1x128xf32>
    %7 = vector.broadcast %6 : vector<1x128xf32> to vector<16x128xf32>
    %8 = arith.addf %5, %7 : vector<16x128xf32>
    %cst_6 = arith.constant 0.000000e+00 : f32
    %9 = vector.broadcast %cst_6 : f32 to vector<16x128xf32>
    %10 = arith.maximumf %8, %9 : vector<16x128xf32>
    %c0_7 = arith.constant 0 : index
    %c0_8 = arith.constant 0 : index
    %11 = vector.load %arg11[%c0_7, %c0_8] : memref<16x32xf32, #tpu.memory_space<vmem>>, vector<16x32xf32>
    %12 = arith.truncf %10 : vector<16x128xf32> to vector<16x128xbf16>
    %c0_9 = arith.constant 0 : index
    %c0_10 = arith.constant 0 : index
    %13 = vector.load %arg7[%c0_9, %c0_10] : memref<128x32xbf16, #tpu.memory_space<vmem>>, vector<128x32xbf16>
    %cst_11 = arith.constant dense<0.000000e+00> : vector<16x32xf32>
    %14 = tpu.matmul %12, %13, %cst_11 {dimension_numbers = #tpu.dot_dimension_numbers<[1], [0], [0], [1], [0, 0, 1, 1], [], []>} : vector<16x128xbf16>, vector<128x32xbf16>, vector<16x32xf32> -> vector<16x32xf32>
    %15 = arith.addf %11, %14 : vector<16x32xf32>
    %c0_12 = arith.constant 0 : index
    %c0_13 = arith.constant 0 : index
    %16 = vector.load %arg11[%c0_12, %c0_13] : memref<16x32xf32, #tpu.memory_space<vmem>>, vector<16x32xf32>
    tpu.vector_store %arg11[%c0_12, %c0_13], %15 {strides = array<i32>} : memref<16x32xf32, #tpu.memory_space<vmem>>, vector<16x32xf32>,
    %c0_i32_14 = arith.constant 0 : i32
    %17 = arith.cmpi eq, %arg1, %c0_i32_14 : i32
    %18 = arith.extui %17 : i1 to i32
    %c0_i32_15 = arith.constant 0 : i32
    %19 = arith.cmpi ne, %18, %c0_i32_15 : i32
    scf.if %19 {
      %c0_16 = arith.constant 0 : index
      %c0_17 = arith.constant 0 : index
      %20 = vector.load %arg11[%c0_16, %c0_17] : memref<16x32xf32, #tpu.memory_space<vmem>>, vector<16x32xf32>
      %c0_18 = arith.constant 0 : index
      %c0_19 = arith.constant 0 : index
      %21 = vector.load %arg8[%c0_18, %c0_19] : memref<1x32xf32, #tpu.memory_space<vmem>>, vector<1x32xf32>
      %22 = vector.broadcast %21 : vector<1x32xf32> to vector<16x32xf32>
      %23 = arith.addf %20, %22 : vector<16x32xf32>
      %c0_20 = arith.constant 0 : index
      %c0_21 = arith.constant 0 : index
      %24 = vector.load %arg9[%c0_20, %c0_21] : memref<16x32xbf16, #tpu.memory_space<vmem>>, vector<16x32xbf16>
      %25 = arith.extf %24 : vector<16x32xbf16> to vector<16x32xf32>
      %26 = arith.addf %23, %25 : vector<16x32xf32>
      %27 = arith.truncf %26 : vector<16x32xf32> to vector<16x32xbf16>
      %c0_22 = arith.constant 0 : index
      %c0_23 = arith.constant 0 : index
      %28 = vector.load %arg10[%c0_22, %c0_23] : memref<16x32xbf16, #tpu.memory_space<vmem>>, vector<16x32xbf16>
      tpu.vector_store %arg10[%c0_22, %c0_23], %27 {strides = array<i32>} : memref<16x32xbf16, #tpu.memory_space<vmem>>, vector<16x32xbf16>,
    } else {
    }
    return
  }
  func.func @transform_0(%arg0: i32, %arg1: i32) -> (i32, i32) {
    %c0_i32 = arith.constant 0 : i32
    %c0_i32_0 = arith.constant 0 : i32
    return %arg0, %c0_i32 : i32, i32
  }
  func.func @transform_1(%arg0: i32, %arg1: i32) -> (i32, i32) {
    %c0_i32 = arith.constant 0 : i32
    %c0_i32_0 = arith.constant 0 : i32
    %c0_i32_1 = arith.constant 0 : i32
    return %c0_i32, %c0_i32_0 : i32, i32
  }
  func.func @transform_2(%arg0: i32, %arg1: i32) -> (i32, i32) {
    %c0_i32 = arith.constant 0 : i32
    %c0_i32_0 = arith.constant 0 : i32
    %c0_i32_1 = arith.constant 0 : i32
    return %c0_i32, %c0_i32_0 : i32, i32
  }
  func.func @transform_3(%arg0: i32, %arg1: i32) -> (i32, i32) {
    %c0_i32 = arith.constant 0 : i32
    %c0_i32_0 = arith.constant 0 : i32
    return %c0_i32, %arg1 : i32, i32
  }
  func.func @transform_4(%arg0: i32, %arg1: i32) -> (i32, i32) {
    %c0_i32 = arith.constant 0 : i32
    %c0_i32_0 = arith.constant 0 : i32
    return %c0_i32, %arg1 : i32, i32
  }
  func.func @transform_5(%arg0: i32, %arg1: i32) -> (i32, i32) {
    %c0_i32 = arith.constant 0 : i32
    %c0_i32_0 = arith.constant 0 : i32
    return %arg1, %c0_i32 : i32, i32
  }
  func.func @transform_6(%arg0: i32, %arg1: i32) -> (i32, i32) {
    %c0_i32 = arith.constant 0 : i32
    %c0_i32_0 = arith.constant 0 : i32
    %c0_i32_1 = arith.constant 0 : i32
    return %c0_i32, %c0_i32_0 : i32, i32
  }
  func.func @transform_7(%arg0: i32, %arg1: i32) -> (i32, i32) {
    %c0_i32 = arith.constant 0 : i32
    %c0_i32_0 = arith.constant 0 : i32
    return %arg0, %c0_i32 : i32, i32
  }
  func.func @transform_8(%arg0: i32, %arg1: i32) -> (i32, i32) {
    %c0_i32 = arith.constant 0 : i32
    %c0_i32_0 = arith.constant 0 : i32
    return %arg0, %c0_i32 : i32, i32
  }
}

module attributes {stable_mosaic.version = 11 : i64} {
  func.func @_linear_kernel(%arg0: i32, %arg1: i32, %arg2: memref<16x32xbf16, #tpu.memory_space<vmem>>, %arg3: memref<32x128xbf16, #tpu.memory_space<vmem>>, %arg4: memref<1x128xf32, #tpu.memory_space<vmem>>, %arg5: memref<16x128xbf16, #tpu.memory_space<vmem>>) attributes {dimension_semantics = [#tpu.dimension_semantics<parallel>, #tpu.dimension_semantics<parallel>], iteration_bounds = array<i64: 1, 1>, scalar_prefetch = 0 : i64, scratch_operands = 0 : i64, tpu.core_type = #tpu.core_type<tc>, window_params = [{transform_indices = @transform_0, window_bounds = array<i64: 16, 32>}, {transform_indices = @transform_1, window_bounds = array<i64: 32, 128>}, {transform_indices = @transform_2, window_bounds = array<i64: 1, 128>}, {transform_indices = @transform_3, window_bounds = array<i64: 16, 128>}]} {
    %c0 = arith.constant 0 : index
    %c0_0 = arith.constant 0 : index
    %0 = vector.load %arg2[%c0, %c0_0] : memref<16x32xbf16, #tpu.memory_space<vmem>>, vector<16x32xbf16>
    %c0_1 = arith.constant 0 : index
    %c0_2 = arith.constant 0 : index
    %1 = vector.load %arg3[%c0_1, %c0_2] : memref<32x128xbf16, #tpu.memory_space<vmem>>, vector<32x128xbf16>
    %cst = arith.constant dense<0.000000e+00> : vector<16x128xf32>
    %2 = tpu.matmul %0, %1, %cst {dimension_numbers = #tpu.dot_dimension_numbers<[1], [0], [0], [1], [0, 0, 1, 1], [], []>} : vector<16x32xbf16>, vector<32x128xbf16>, vector<16x128xf32> -> vector<16x128xf32>
    %c0_3 = arith.constant 0 : index
    %c0_4 = arith.constant 0 : index
    %3 = vector.load %arg4[%c0_3, %c0_4] : memref<1x128xf32, #tpu.memory_space<vmem>>, vector<1x128xf32>
    %4 = vector.broadcast %3 : vector<1x128xf32> to vector<16x128xf32>
    %5 = arith.addf %2, %4 : vector<16x128xf32>
    %6 = arith.truncf %5 : vector<16x128xf32> to vector<16x128xbf16>
    %c0_5 = arith.constant 0 : index
    %c0_6 = arith.constant 0 : index
    %7 = vector.load %arg5[%c0_5, %c0_6] : memref<16x128xbf16, #tpu.memory_space<vmem>>, vector<16x128xbf16>
    tpu.vector_store %arg5[%c0_5, %c0_6], %6 {strides = array<i32>} : memref<16x128xbf16, #tpu.memory_space<vmem>>, vector<16x128xbf16>,
    return
  }
  func.func @transform_0(%arg0: i32, %arg1: i32) -> (i32, i32) {
    %c0_i32 = arith.constant 0 : i32
    %c0_i32_0 = arith.constant 0 : i32
    return %arg0, %c0_i32 : i32, i32
  }
  func.func @transform_1(%arg0: i32, %arg1: i32) -> (i32, i32) {
    %c0_i32 = arith.constant 0 : i32
    %c0_i32_0 = arith.constant 0 : i32
    return %c0_i32, %arg1 : i32, i32
  }
  func.func @transform_2(%arg0: i32, %arg1: i32) -> (i32, i32) {
    %c0_i32 = arith.constant 0 : i32
    %c0_i32_0 = arith.constant 0 : i32
    return %c0_i32, %arg1 : i32, i32
  }
  func.func @transform_3(%arg0: i32, %arg1: i32) -> (i32, i32) {
    %c0_i32 = arith.constant 0 : i32
    return %arg0, %arg1 : i32, i32
  }
}

module attributes {stable_mosaic.version = 11 : i64} {
  func.func @_norm_linear_kernel(%arg0: i32, %arg1: i32, %arg2: memref<16x32xbf16, #tpu.memory_space<vmem>>, %arg3: memref<1x32xf32, #tpu.memory_space<vmem>>, %arg4: memref<1x32xf32, #tpu.memory_space<vmem>>, %arg5: memref<32x128xbf16, #tpu.memory_space<vmem>>, %arg6: memref<1x128xf32, #tpu.memory_space<vmem>>, %arg7: memref<16x128xf32, #tpu.memory_space<vmem>>, %arg8: memref<16x32xbf16, #tpu.memory_space<vmem>>) attributes {dimension_semantics = [#tpu.dimension_semantics<parallel>, #tpu.dimension_semantics<arbitrary>], iteration_bounds = array<i64: 1, 1>, scalar_prefetch = 0 : i64, scratch_operands = 1 : i64, tpu.core_type = #tpu.core_type<tc>, window_params = [{transform_indices = @transform_0, window_bounds = array<i64: 16, 32>}, {pipeline_mode = #tpu.pipeline_mode<synchronous>, transform_indices = @transform_1, window_bounds = array<i64: 1, 32>}, {pipeline_mode = #tpu.pipeline_mode<synchronous>, transform_indices = @transform_2, window_bounds = array<i64: 1, 32>}, {transform_indices = @transform_3, window_bounds = array<i64: 32, 128>}, {transform_indices = @transform_4, window_bounds = array<i64: 1, 128>}, {transform_indices = @transform_5, window_bounds = array<i64: 16, 128>}]} {
    %c0_i32 = arith.constant 0 : i32
    %0 = arith.cmpi eq, %arg1, %c0_i32 : i32
    %1 = arith.extui %0 : i1 to i32
    %c0_i32_0 = arith.constant 0 : i32
    %2 = arith.cmpi ne, %1, %c0_i32_0 : i32
    scf.if %2 {
      %c0_8 = arith.constant 0 : index
      %c0_9 = arith.constant 0 : index
      %10 = vector.load %arg2[%c0_8, %c0_9] : memref<16x32xbf16, #tpu.memory_space<vmem>>, vector<16x32xbf16>
      %11 = arith.extf %10 : vector<16x32xbf16> to vector<16x32xf32>
      %c0_10 = arith.constant 0 : index
      %c0_11 = arith.constant 0 : index
      %12 = vector.load %arg3[%c0_10, %c0_11] : memref<1x32xf32, #tpu.memory_space<vmem>>, vector<1x32xf32>
      %c0_12 = arith.constant 0 : index
      %c0_13 = arith.constant 0 : index
      %13 = vector.load %arg4[%c0_12, %c0_13] : memref<1x32xf32, #tpu.memory_space<vmem>>, vector<1x32xf32>
      %cst_14 = arith.constant dense<0.000000e+00> : vector<16xf32>
      %14 = vector.multi_reduction <add>, %11, %cst_14 [1] : vector<16x32xf32> to vector<16xf32>
      %15 = vector.shape_cast %14 : vector<16xf32> to vector<16x1xf32>
      %cst_15 = arith.constant 3.200000e+01 : f32
      %16 = vector.broadcast %cst_15 : f32 to vector<16x1xf32>
      %17 = arith.divf %15, %16 : vector<16x1xf32>
      %18 = vector.broadcast %17 : vector<16x1xf32> to vector<16x32xf32>
      %19 = arith.subf %11, %18 : vector<16x32xf32>
      %20 = arith.mulf %19, %19 : vector<16x32xf32>
      %cst_16 = arith.constant dense<0.000000e+00> : vector<16xf32>
      %21 = vector.multi_reduction <add>, %20, %cst_16 [1] : vector<16x32xf32> to vector<16xf32>
      %22 = vector.shape_cast %21 : vector<16xf32> to vector<16x1xf32>
      %cst_17 = arith.constant 3.100000e+01 : f32
      %23 = vector.broadcast %cst_17 : f32 to vector<16x1xf32>
      %24 = arith.divf %22, %23 : vector<16x1xf32>
      %25 = math.sqrt %24 : vector<16x1xf32>
      %cst_18 = arith.constant 9.99999997E-7 : f32
      %26 = vector.broadcast %cst_18 : f32 to vector<16x1xf32>
      %27 = arith.addf %25, %26 : vector<16x1xf32>
      %28 = tpu.reciprocal %27 {approx = true} : vector<16x1xf32> -> vector<16x1xf32>
      %29 = vector.broadcast %12 : vector<1x32xf32> to vector<16x32xf32>
      %30 = arith.mulf %29, %19 : vector<16x32xf32>
      %31 = vector.broadcast %28 : vector<16x1xf32> to vector<16x32xf32>
      %32 = arith.mulf %30, %31 : vector<16x32xf32>
      %33 = vector.broadcast %13 : vector<1x32xf32> to vector<16x32xf32>
      %34 = arith.addf %32, %33 : vector<16x32xf32>
      %35 = arith.truncf %34 : vector<16x32xf32> to vector<16x32xbf16>
      %c0_19 = arith.constant 0 : index
      %c0_20 = arith.constant 0 : index
      %36 = vector.load %arg8[%c0_19, %c0_20] : memref<16x32xbf16, #tpu.memory_space<vmem>>, vector<16x32xbf16>
      tpu.vector_store %arg8[%c0_19, %c0_20], %35 {strides = array<i32>} : memref<16x32xbf16, #tpu.memory_space<vmem>>, vector<16x32xbf16>,
    } else {
    }
    %c0 = arith.constant 0 : index
    %c0_1 = arith.constant 0 : index
    %3 = vector.load %arg8[%c0, %c0_1] : memref<16x32xbf16, #tpu.memory_space<vmem>>, vector<16x32xbf16>
    %c0_2 = arith.constant 0 : index
    %c0_3 = arith.constant 0 : index
    %4 = vector.load %arg5[%c0_2, %c0_3] : memref<32x128xbf16, #tpu.memory_space<vmem>>, vector<32x128xbf16>
    %cst = arith.constant dense<0.000000e+00> : vector<16x128xf32>
    %5 = tpu.matmul %3, %4, %cst {dimension_numbers = #tpu.dot_dimension_numbers<[1], [0], [0], [1], [0, 0, 1, 1], [], []>} : vector<16x32xbf16>, vector<32x128xbf16>, vector<16x128xf32> -> vector<16x128xf32>
    %c0_4 = arith.constant 0 : index
    %c0_5 = arith.constant 0 : index
    %6 = vector.load %arg6[%c0_4, %c0_5] : memref<1x128xf32, #tpu.memory_space<vmem>>, vector<1x128xf32>
    %7 = vector.broadcast %6 : vector<1x128xf32> to vector<16x128xf32>
    %8 = arith.addf %5, %7 : vector<16x128xf32>
    %c0_6 = arith.constant 0 : index
    %c0_7 = arith.constant 0 : index
    %9 = vector.load %arg7[%c0_6, %c0_7] : memref<16x128xf32, #tpu.memory_space<vmem>>, vector<16x128xf32>
    tpu.vector_store %arg7[%c0_6, %c0_7], %8 {strides = array<i32>} : memref<16x128xf32, #tpu.memory_space<vmem>>, vector<16x128xf32>,
    return
  }
  func.func @transform_0(%arg0: i32, %arg1: i32) -> (i32, i32) {
    %c0_i32 = arith.constant 0 : i32
    %c0_i32_0 = arith.constant 0 : i32
    return %arg0, %c0_i32 : i32, i32
  }
  func.func @transform_1(%arg0: i32, %arg1: i32) -> (i32, i32) {
    %c0_i32 = arith.constant 0 : i32
    %c0_i32_0 = arith.constant 0 : i32
    %c0_i32_1 = arith.constant 0 : i32
    return %c0_i32, %c0_i32_0 : i32, i32
  }
  func.func @transform_2(%arg0: i32, %arg1: i32) -> (i32, i32) {
    %c0_i32 = arith.constant 0 : i32
    %c0_i32_0 = arith.constant 0 : i32
    %c0_i32_1 = arith.constant 0 : i32
    return %c0_i32, %c0_i32_0 : i32, i32
  }
  func.func @transform_3(%arg0: i32, %arg1: i32) -> (i32, i32) {
    %c0_i32 = arith.constant 0 : i32
    %c0_i32_0 = arith.constant 0 : i32
    return %c0_i32, %arg1 : i32, i32
  }
  func.func @transform_4(%arg0: i32, %arg1: i32) -> (i32, i32) {
    %c0_i32 = arith.constant 0 : i32
    %c0_i32_0 = arith.constant 0 : i32
    return %c0_i32, %arg1 : i32, i32
  }
  func.func @transform_5(%arg0: i32, %arg1: i32) -> (i32, i32) {
    %c0_i32 = arith.constant 0 : i32
    return %arg0, %arg1 : i32, i32
  }
}

</mosaic_0001>

<bundles_post_ra>
// kernel: transformer_forward.36
= control target key start
LH: loop header
LB: loop body
LE: loop exit
PB: predicated region body
PF: predicated region fallthrough
CT: control target
= control target key end

     0   :  { %s865_s15 = smov 0   ;;  %s867_s16 = smov 0   ;;  %s942_s0 = inlined_call_operand.vmem [shape: f32[2,8,8], index: 0, kind: input, shape index: {}]   ;;  %s943_s1 = inlined_call_operand.vmem [shape: bf16[2,4,8,8], index: 1, kind: input, shape index: {}]   ;;  %s944_s2 = inlined_call_operand.vmem [shape: bf16[2,4,8,8], index: 2, kind: input, shape index: {}]   ;;  %s945_s3 = inlined_call_operand.vmem [shape: bf16[2,4,8,8], index: 3, kind: input, shape index: {}]   ;;  %s946_s4 = inlined_call_operand.vmem [shape: bf16[2,4,8,8], index: 4, kind: output, shape index: {}]  }
   0x1   :  { %s869_s17 = smov 0   ;;  %s871_s18 = smov 0  }
   0x2   :  { %s873_s19 = smov 0  }
   0x3 LB: > { %s36_s20 = sadd.s32 1, %s826_s17  ;;  %s40_s21 = sadd.s32 1, %s830_s18  ;;  %s834_s19 = sphi %s873_s19, %s14_s19   ;;  %s830_s18 = sphi %s871_s18, %s950_s18   ;;  %s826_s17 = sphi %s869_s17, %s949_s17   ;;  %s822_s16 = sphi %s867_s16, %s948_s16   ;;  %s818_s15 = sphi %s865_s15, %s947_s15  }
   0x4   : > { %p38_p0 = scmp.ge.s32.totalorder %s36_s20, 4  ;;  %p714_p1 = scmp.ge.s32.totalorder %s834_s19, 1 }
   0x5   : > { %p261_p2 = scmp.lt.s32.totalorder %s834_s19, 9 }
   0x6   : > { %s952_s20 = smov (%p38_p0, %s36_s20), 0  ;;  %s954_s21 = smov (!%p38_p0, %s40_s21), %s830_s18 }
   0x7   : > { %p262_p3 = pnand %p714_p1, %p261_p2  ;;  %p42_p4 = scmp.ge.s32.totalorder %s954_s21, 2 }
   0x8   : > { %p331_p5 = scmp.lt.s32.totalorder (!%p262_p3), %s822_s16, 1  ;;  %p343_p6 = scmp.lt.s32.totalorder (!%p262_p3), %s818_s15, 3  ;;  %vm393_vm0 = vcmask (!%p262_p3), 64512   ;;  %v836_v0 = vmov (!%p262_p3), 0.0   ;;  %vm837_vm1 = vmmov (!%p262_p3), 0   ;;  %vm390_vm2 = vcmask (!%p262_p3), 7168  }
   0x9   : > { %s956_s21 = smov (%p42_p4, %s954_s21), 0  ;;  %265 = sbr.rel (%p262_p3) target bundleno = 831 (0x33f), region = 36 }
   0xa   : > { %732 = vmatprep.subr.bf16.mxu0 (!%p262_p3), %v836_v0  ;;  %394 = vst.msk [vmem:[#allocation4] sm:$0xff] (!%p262_p3), %vm393_vm0, %v836_v0  ;;  %734 = vmatprep.mubr.msk.bf16.mxu0 (!%p262_p3), %vm837_vm1, %v836_v0  ;;  %v838_v4 = vmov (!%p262_p3), -inf   ;;  %v839_v13 = vmov (!%p262_p3), 0   ;;  %vm483_vm3 = vcmask (!%p262_p3), 1043456   ;;  %vm543_vm4 = vcmask (!%p262_p3), 60416  }
   0xb   : > { %738 = vmatprep.subr.bf16.mxu1 (!%p262_p3), %v836_v0  ;;  %740 = vmatprep.mubr.msk.bf16.mxu1 (!%p262_p3), %vm837_vm1, %v836_v0  ;;  %391 = vst.msk [vmem:[#allocation2] sm:$0xff] (!%p262_p3), %vm390_vm2, %v838_v4  ;;  %392 = vst.msk [vmem:[#allocation3] sm:$0xff] (!%p262_p3), %vm390_vm2, %v836_v0 }
   0xc   : > { %788 = vset.pattern.permute.xlu0 (!%p262_p3), %v839_v13  ;;  %789 = vset.pattern.permute.xlu1 (!%p262_p3), %v839_v13 }
  0x10   : > { %s958_s16 = smov (!%p331_p5, %s822_s16), 1  ;;  %s960_s15 = smov (!%p343_p6, %s818_s15), 3 }
  0x11   : > { %s716_s22 = sshll.u32 %s958_s16, 2  ;;  %s715_s5 = sshll.u32 %s958_s16, 3  ;;  %v472_v34 = vld [vmem:[#allocation4] sm:$0xff] }
  0x12   : > { %s349_s23 = sadd.s32 %s716_s22, %s960_s15  ;;  %s340_s8 = scalar_lea.vmem %s942_s0, %s715_s5  ;;  %v448_v14 = vld [vmem:[#allocation2] sm:$0xff]  ;;  %v464_v28 = vld [vmem:[#allocation3] sm:$0xff] }
  0x13   : > { %s896_s24 = sshll.u32 %s349_s23, 2  ;;  %v446_v6 = vld [vmem:[%s340_s8] sm:$0xff] }
  0x14   : > { %s362_s27 = scalar_lea.vmem %s944_s2, %s896_s24  ;;  %s351_s30 = scalar_lea.vmem %s943_s1, %s896_s24 }
  0x15   : > { %v396_v1 = vld [vmem:[%s362_s27] sm:$0xf]  ;;  %s373_s11 = scalar_lea.vmem %s945_s3, %s896_s24  ;;  %s384_s14 = scalar_lea.vmem %s946_s4, %s896_s24 }
  0x16   : > { %v403_v2 = vsel %vm393_vm0, %v396_v1, 0  ;;  %v395_v3 = vld [vmem:[%s351_s30] sm:$0xf] }
  0x17   : > { %733 = vmatpush3.bf16.xpose.msra.mxu0 %v403_v2  ;;  %v397_v18 = vld [vmem:[%s373_s11] sm:$0xf] }
  0x18   : > { %v485_v19 = vsel %vm483_vm3, %v397_v18, 0 }
  0x19   : > { %739 = vmatpush3.bf16.msra.mxu1 %v485_v19 }
  0x1e   : > { %735 = vmatmul.mubr.msk.bf16.vlgmr.msra.gmra.mrb[0].mxu0 %vm393_vm0, %v395_v3 }
  0xf1   : > { %v439_v5 = vpop.f32.mrb[0].mxu0 }
  0xf2   : > { %v445_v7 = vmul.f32 0.35355338, %v439_v5  ;;  %v736_v8 = vpop.f32.mrb[1].mxu0 }
  0xf3   : > { %v442_v9 = vpop.f32.mrb[2].mxu0 }
  0xf4   : > { %v737_v10 = vpop.f32.mrb[3].mxu0  ;;  %v447_v11 = vadd.f32 %v446_v6, %v445_v7 }
  0xf6   : > { %v449_v12 = vsel %vm393_vm0, %v447_v11, -inf }
  0xf7   : > { %450 = vmax.xlane.f32.xlu0 %v449_v12 }
 0x184   : > { %v451_v15 = vpop.xlane.xlu0 %450 }
 0x185   : > { %v452_v16 = vmax.f32 %v448_v14, %v451_v15 }
 0x187   : > { %v453_v17 = vsub.f32 %v448_v14, %v452_v16  ;;  %529 = vst.msk [vmem:[#allocation2] sm:$0xff] %vm390_vm2, %v452_v16  ;;  %458 = vperm.xlu0 %788, %v452_v16  }
 0x189   : > { %v454_v26 = vmul.f32 1.442695, %v453_v17 }
 0x206   : > { %v459_v20 = vpop.permute.xlu0 %458 }
 0x207   : > { %v461_v21 = vsub.f32 %v447_v11, %v459_v20 }
 0x209   : > { %v462_v22 = vmul.f32 1.442695, %v461_v21 }
 0x20b   : > { %790 = vpow2.f32 %v462_v22 }
 0x20c   : > { %792 = vpow2.f32 %v454_v26 }
 0x215   : > { %v791_v23 = vpop.eup %790 }
 0x216   : > { %v466_v24 = vsel %vm393_vm0, %v791_v23, 0.0  ;;  %v479_v25 = vpack.c.bf16 %v791_v23, %v791_v23  ;;  %v793_v27 = vpop.eup %792 }
 0x217   : > { %467 = vadd.xlane.f32.xlu1 %v466_v24  ;;  %v465_v29 = vmul.f32 %v793_v27, %v464_v28 }
 0x218   : > { %741 = vmatmul.mubr.msk.bf16.vlgmr.msra.gmra.mrb[0].mxu1 %vm393_vm0, %v479_v25 }
 0x228   : > { %475 = vperm.xlu1 %789, %v793_v27  }
 0x2a4   : > { %v468_v30 = vpop.xlane.xlu1 %467 }
 0x2a5   : > { %v469_v31 = vadd.f32 %v468_v30, %v465_v29 }
 0x2a7   : > { %471 = vst.msk [vmem:[#allocation3] sm:$0xff] %vm390_vm2, %v469_v31 }
 0x2a8   : > { %v476_v35 = vpop.permute.xlu1 %475 }
 0x2a9   : > { %v478_v36 = vmul.f32 %v476_v35, %v472_v34 }
 0x2ae   : > { %v534_v32 = vld [vmem:[#allocation3] sm:$0xff] }
 0x2af   : > { %794 = vrcp.f32 %v534_v32 }
 0x2b9   : > { %v795_v33 = vpop.eup %794 }
 0x2ba   : > { %538 = vperm.xlu1 %789, %v795_v33  }
 0x2eb   : > { %v521_v37 = vpop.f32.mrb[0].mxu1 }
 0x2ec   : > { %v527_v38 = vadd.f32 %v521_v37, %v478_v36  ;;  %v742_v39 = vpop.f32.mrb[1].mxu1 }
 0x2ed   : > { %v524_v40 = vpop.f32.mrb[2].mxu1 }
 0x2ee   : > { %528 = vst.msk [vmem:[#allocation4] sm:$0xff] %vm393_vm0, %v527_v38  ;;  %v743_v41 = vpop.f32.mrb[3].mxu1 }
 0x2f5   : > { %v533_v42 = vld [vmem:[#allocation4] sm:$0xff] }
 0x339   : > { %v539_v43 = vpop.permute.xlu1 %538 }
 0x33a   : > { %v541_v44 = vmul.f32 %v539_v43, %v533_v42 }
 0x33c   : > { %v542_v45 = vpack.c.bf16 %v541_v44, %v541_v44 }
 0x33e   : > { %544 = vst.msk [vmem:[%s384_s14] sm:$0xf] %vm543_vm4, %v542_v45 }
 0x33f PF: > { %s14_s19 = sadd.s32 1, %s834_s19   ;;  %s947_s15 = smov %s826_s17 }
 0x340   : > { %p11_p7 = scmp.ge.s32.totalorder %s14_s19, 10   ;;  %s948_s16 = smov %s830_s18 }
 0x341   : > { %s949_s17 = smov %s952_s20  ;;  %s950_s18 = smov %s956_s21 }
 0x342   :  { %13 = sbr.rel (!%p11_p7) target bundleno = 3 (0x3), region = 83 }

// kernel: transformer_forward.35
= control target key start
LH: loop header
LB: loop body
LE: loop exit
PB: predicated region body
PF: predicated region fallthrough
CT: control target
= control target key end

     0   :  { %vm31_vm0 = vcmask 261120   ;;  %v217_v16 = vmov 0.0   ;;  %vm218_vm1 = vmmov 0   ;;  %s276_s0 = inlined_call_operand.vmem [shape: bf16[16,32], index: 0, kind: input, shape index: {}]   ;;  %s277_s3 = inlined_call_operand.vmem [shape: bf16[32,128], index: 3, kind: input, shape index: {}]   ;;  %s278_s1 = inlined_call_operand.vmem [shape: f32[1,32], index: 1, kind: input, shape index: {}]   ;;  %s279_s2 = inlined_call_operand.vmem [shape: f32[1,32], index: 2, kind: input, shape index: {}]   ;;  %s280_s4 = inlined_call_operand.vmem [shape: f32[1,128], index: 4, kind: input, shape index: {}]   ;;  %s281_s5 = inlined_call_operand.vmem [shape: bf16[16,128], index: 5, kind: output, shape index: {}]  }
   0x1   :  { %v186_v0 = vld [vmem:[%s276_s0] sm:$0xff]   ;;  %197 = vmatprep.subr.bf16.mxu0 %v217_v16  ;;  %v208_v17 = vld [vmem:[%s277_s3 + $0x8] sm:$0xff]   ;;  %201 = vmatprep.mubr.msk.bf16.mxu0 %vm218_vm1, %v217_v16 }
   0x2   :  { %v187_v1 = vunpack.c.l.bf16 %v186_v0  ;;  %v188_v2 = vunpack.c.h.bf16 %v186_v0  ;;  %v207_v15 = vld [vmem:[%s277_s3] sm:$0xff]  }
   0x3   :  { %198 = vmatpush3.bf16.msra.mxu0 %v207_v15  ;;  %v175_v34 = vld [vmem:[%s278_s1] ss:$0 sm:$0xff] }
   0x4   :  { %v32_v3 = vsel %vm31_vm0, %v187_v1, 0.0  ;;  %v35_v4 = vsel %vm31_vm0, %v188_v2, 0.0  ;;  %199 = vmatprep.subr.bf16.mxu0 %v217_v16  ;;  %v176_v40 = vld [vmem:[%s279_s2] ss:$0 sm:$0xff] }
   0x5   :  { %33 = vadd.xlane.f32.xlu0 %v32_v3  ;;  %v177_v46 = vld [vmem:[%s280_s4] ss:$0 sm:$0xff] }
   0x7   :  { %200 = vmatpush3.bf16.msra.mxu0 %v208_v17 }
   0x9   :  { %36 = vadd.xlane.f32.xlu0 %v35_v4 }
  0x92   :  { %v34_v5 = vpop.xlane.xlu0 %33 }
  0x93   :  { %v39_v6 = vmul.f32 0.03125, %v34_v5 }
  0x95   :  { %v41_v7 = vsub.f32 %v187_v1, %v39_v6 }
  0x96   :  { %v37_v8 = vpop.xlane.xlu0 %36 }
  0x97   :  { %v40_v9 = vmul.f32 0.03125, %v37_v8  ;;  %v43_v10 = vmul.f32 %v41_v7, %v41_v7  ;;  %v78_v36 = vmul.f32 %v175_v34, %v41_v7 }
  0x99   :  { %v42_v11 = vsub.f32 %v188_v2, %v40_v9  ;;  %v45_v12 = vsel %vm31_vm0, %v43_v10, 0.0 }
  0x9a   :  { %46 = vadd.xlane.f32.xlu1 %v45_v12 }
  0x9b   :  { %v44_v13 = vmul.f32 %v42_v11, %v42_v11  ;;  %v79_v37 = vmul.f32 %v175_v34, %v42_v11 }
  0x9d   :  { %v48_v14 = vsel %vm31_vm0, %v44_v13, 0.0 }
  0x9e   :  { %49 = vadd.xlane.f32.xlu1 %v48_v14 }
 0x127   :  { %v47_v18 = vpop.xlane.xlu1 %46 }
 0x128   :  { %v52_v19 = vmul.f32 0.032258064, %v47_v18 }
 0x12a   :  { %209 = vrsqrt.f32 %v52_v19  ;;  %vm56_vm2 = vcmp.eq.f32.partialorder %v52_v19, inf  ;;  %v59_v24 = vand.u32 2147483648, %v52_v19  ;;  %vm58_vm3 = vcmp.eq.f32.partialorder %v52_v19, 0.0 }
 0x12b   :  { %v50_v20 = vpop.xlane.xlu1 %49 }
 0x12c   :  { %v53_v21 = vmul.f32 0.032258064, %v50_v20 }
 0x12e   :  { %211 = vrsqrt.f32 %v53_v21  ;;  %vm63_vm4 = vcmp.eq.f32.partialorder %v53_v21, inf  ;;  %v66_v30 = vand.u32 2147483648, %v53_v21  ;;  %vm65_vm5 = vcmp.eq.f32.partialorder %v53_v21, 0.0 }
 0x134   :  { %v210_v22 = vpop.eup %209 }
 0x135   :  { %v55_v23 = vmul.f32 %v210_v22, %v52_v19 }
 0x137   :  { %v57_v25 = vsel %vm56_vm2, %v52_v19, %v55_v23 }
 0x138   :  { %v212_v26 = vpop.eup %211  ;;  %v60_v27 = vsel %vm58_vm3, %v59_v24, %v57_v25 }
 0x139   :  { %v68_v28 = vadd.f32 1e-06, %v60_v27  ;;  %v62_v29 = vmul.f32 %v212_v26, %v53_v21 }
 0x13b   :  { %213 = vrcp.f32 %v68_v28  ;;  %v64_v31 = vsel %vm63_vm4, %v53_v21, %v62_v29 }
 0x13c   :  { %v67_v32 = vsel %vm65_vm5, %v66_v30, %v64_v31 }
 0x13d   :  { %v69_v33 = vadd.f32 1e-06, %v67_v32 }
 0x13f   :  { %215 = vrcp.f32 %v69_v33 }
 0x145   :  { %v214_v35 = vpop.eup %213 }
 0x146   :  { %v80_v38 = vmul.f32 %v214_v35, %v78_v36 }
 0x148   :  { %v88_v42 = vadd.f32 %v176_v40, %v80_v38 }
 0x149   :  { %v216_v39 = vpop.eup %215 }
 0x14a   :  { %v81_v41 = vmul.f32 %v216_v39, %v79_v37 }
 0x14c   :  { %v89_v43 = vadd.f32 %v176_v40, %v81_v41 }
 0x14e   :  { %v90_v44 = vpack.c.bf16 %v89_v43, %v88_v42 }
 0x150   :  { %91 = vst.msk [vmem:[#allocation2] sm:$0xff] %vm31_vm0, %v90_v44 }
 0x157   :  { %v92_v45 = vld [vmem:[#allocation2] sm:$0xff] }
 0x158   :  { %202 = vmatmul.mubr.msk.bf16.vlgmr.msra.gmra.mrb[0].mxu0 %vm31_vm0, %v92_v45 }
 0x22b   :  { %v154_v47 = vpop.f32.mrb[0].mxu0 }
 0x22c   :  { %v203_v48 = vpop.f32.mrb[1].mxu0  ;;  %v155_v50 = vadd.f32 %v177_v46, %v154_v47 }
 0x22d   :  { %v157_v49 = vpop.f32.mrb[2].mxu0 }
 0x22e   :  { %v158_v51 = vadd.f32 %v177_v46, %v157_v49  ;;  %v204_v52 = vpop.f32.mrb[3].mxu0 }
 0x230   :  { %v192_v53 = vpack.c.bf16 %v158_v51, %v155_v50 }
 0x232   :  { %193 = vst [vmem:[%s281_s5] sm:$0xff] %v192_v53  }

// kernel: transformer_forward.37
= control target key start
LH: loop header
LB: loop body
LE: loop exit
PB: predicated region body
PF: predicated region fallthrough
CT: control target
= control target key end

     0   :  { %v147_v0 = vmov 0.0   ;;  %vm148_vm0 = vmmov 0   ;;  %vm48_vm1 = vcmask 261120   ;;  %s192_s1 = inlined_call_operand.vmem [shape: bf16[32,128], index: 1, kind: input, shape index: {}]   ;;  %s193_s0 = inlined_call_operand.vmem [shape: bf16[16,32], index: 0, kind: input, shape index: {}]   ;;  %s194_s2 = inlined_call_operand.vmem [shape: f32[1,128], index: 2, kind: input, shape index: {}]   ;;  %s195_s3 = inlined_call_operand.vmem [shape: bf16[16,128], index: 3, kind: input, shape index: {}]   ;;  %s196_s4 = inlined_call_operand.vmem [shape: bf16[16,128], index: 4, kind: output, shape index: {}]  }
   0x1   :  { %134 = vmatprep.subr.bf16.mxu0 %v147_v0  ;;  %v144_v1 = vld [vmem:[%s192_s1] sm:$0xff]   ;;  %138 = vmatprep.mubr.msk.bf16.mxu0 %vm148_vm0, %v147_v0  ;;  %v145_v2 = vld [vmem:[%s192_s1 + $0x8] sm:$0xff]  }
   0x2   :  { %135 = vmatpush3.bf16.msra.mxu0 %v144_v1  ;;  %v146_v3 = vld [vmem:[%s193_s0] sm:$0xff]  }
   0x3   :  { %136 = vmatprep.subr.bf16.mxu0 %v147_v0  ;;  %v113_v4 = vld [vmem:[%s194_s2] ss:$0 sm:$0xff] }
   0x4   :  { %v123_v5 = vld [vmem:[%s195_s3] sm:$0xff]  }
   0x5   :  { %v124_v8 = vunpack.c.l.bf16 %v123_v5  ;;  %v125_v10 = vunpack.c.h.bf16 %v123_v5 }
   0x6   :  { %137 = vmatpush3.bf16.msra.mxu0 %v145_v2 }
   0x9   :  { %139 = vmatmul.mubr.msk.bf16.vlgmr.msra.gmra.mrb[0].mxu0 %vm48_vm1, %v146_v3 }
  0xdc   :  { %v86_v6 = vpop.f32.mrb[0].mxu0 }
  0xdd   :  { %v87_v7 = vadd.f32 %v113_v4, %v86_v6  ;;  %v140_v9 = vpop.f32.mrb[1].mxu0 }
  0xde   :  { %v89_v11 = vpop.f32.mrb[2].mxu0 }
  0xdf   :  { %v90_v12 = vadd.f32 %v113_v4, %v89_v11  ;;  %v141_v13 = vpop.f32.mrb[3].mxu0  ;;  %v97_v14 = vadd.f32 %v124_v8, %v87_v7 }
  0xe1   :  { %v98_v15 = vadd.f32 %v125_v10, %v90_v12 }
  0xe3   :  { %v129_v16 = vpack.c.bf16 %v98_v15, %v97_v14 }
  0xe5   :  { %130 = vst [vmem:[%s196_s4] sm:$0xff] %v129_v16  }

// kernel: transformer_forward.27
= control target key start
LH: loop header
LB: loop body
LE: loop exit
PB: predicated region body
PF: predicated region fallthrough
CT: control target
= control target key end

     0   :  { %s851_s15 = smov 0   ;;  %s853_s16 = smov 0   ;;  %s928_s0 = inlined_call_operand.vmem [shape: f32[2,1,8], index: 0, kind: input, shape index: {}]   ;;  %s929_s1 = inlined_call_operand.vmem [shape: bf16[2,4,8,8], index: 1, kind: input, shape index: {}]   ;;  %s930_s2 = inlined_call_operand.vmem [shape: bf16[2,4,8,8], index: 2, kind: input, shape index: {}]   ;;  %s931_s3 = inlined_call_operand.vmem [shape: bf16[2,4,8,8], index: 3, kind: input, shape index: {}]   ;;  %s932_s4 = inlined_call_operand.vmem [shape: bf16[2,4,8,8], index: 4, kind: output, shape index: {}]  }
   0x1   :  { %s855_s17 = smov 0   ;;  %s857_s18 = smov 0  }
   0x2   :  { %s859_s19 = smov 0  }
   0x3 LB: > { %s36_s20 = sadd.s32 1, %s812_s17  ;;  %s40_s21 = sadd.s32 1, %s816_s18  ;;  %s820_s19 = sphi %s859_s19, %s14_s19   ;;  %s816_s18 = sphi %s857_s18, %s936_s18   ;;  %s812_s17 = sphi %s855_s17, %s935_s17   ;;  %s808_s16 = sphi %s853_s16, %s934_s16   ;;  %s804_s15 = sphi %s851_s15, %s933_s15  }
   0x4   : > { %p38_p0 = scmp.ge.s32.totalorder %s36_s20, 4  ;;  %p700_p1 = scmp.ge.s32.totalorder %s820_s19, 1 }
   0x5   : > { %p255_p2 = scmp.lt.s32.totalorder %s820_s19, 9 }
   0x6   : > { %s938_s20 = smov (%p38_p0, %s36_s20), 0  ;;  %s940_s21 = smov (!%p38_p0, %s40_s21), %s816_s18 }
   0x7   : > { %p256_p3 = pnand %p700_p1, %p255_p2  ;;  %p42_p4 = scmp.ge.s32.totalorder %s940_s21, 2 }
   0x8   : > { %p321_p5 = scmp.lt.s32.totalorder (!%p256_p3), %s808_s16, 1  ;;  %p329_p6 = scmp.lt.s32.totalorder (!%p256_p3), %s804_s15, 3  ;;  %vm379_vm0 = vcmask (!%p256_p3), 64512   ;;  %v822_v0 = vmov (!%p256_p3), 0.0   ;;  %vm823_vm1 = vmmov (!%p256_p3), 0   ;;  %vm376_vm2 = vcmask (!%p256_p3), 7168  }
   0x9   : > { %s942_s21 = smov (%p42_p4, %s940_s21), 0  ;;  %259 = sbr.rel (%p256_p3) target bundleno = 831 (0x33f), region = 36 }
   0xa   : > { %718 = vmatprep.subr.bf16.mxu0 (!%p256_p3), %v822_v0  ;;  %380 = vst.msk [vmem:[#allocation4] sm:$0xff] (!%p256_p3), %vm379_vm0, %v822_v0  ;;  %720 = vmatprep.mubr.msk.bf16.mxu0 (!%p256_p3), %vm823_vm1, %v822_v0  ;;  %v824_v4 = vmov (!%p256_p3), -inf   ;;  %v825_v13 = vmov (!%p256_p3), 0   ;;  %vm475_vm3 = vcmask (!%p256_p3), 1043456   ;;  %vm535_vm4 = vcmask (!%p256_p3), 60416  }
   0xb   : > { %724 = vmatprep.subr.bf16.mxu1 (!%p256_p3), %v822_v0  ;;  %726 = vmatprep.mubr.msk.bf16.mxu1 (!%p256_p3), %vm823_vm1, %v822_v0  ;;  %377 = vst.msk [vmem:[#allocation2] sm:$0xff] (!%p256_p3), %vm376_vm2, %v824_v4  ;;  %378 = vst.msk [vmem:[#allocation3] sm:$0xff] (!%p256_p3), %vm376_vm2, %v822_v0 }
   0xc   : > { %774 = vset.pattern.permute.xlu0 (!%p256_p3), %v825_v13  ;;  %775 = vset.pattern.permute.xlu1 (!%p256_p3), %v825_v13 }
  0x10   : > { %s944_s16 = smov (!%p321_p5, %s808_s16), 1  ;;  %s946_s15 = smov (!%p329_p6, %s804_s15), 3 }
  0x11   : > { %s701_s22 = sshll.u32 %s944_s16, 2  ;;  %s326_s7 = scalar_lea.vmem %s928_s0, %s944_s16  ;;  %v464_v34 = vld [vmem:[#allocation4] sm:$0xff] }
  0x12   : > { %s335_s23 = sadd.s32 %s701_s22, %s946_s15  ;;  %v710_v6 = vld [vmem:[%s326_s7] ss:$0 sm:$0xff]  ;;  %v456_v28 = vld [vmem:[#allocation3] sm:$0xff] }
  0x13   : > { %s882_s24 = sshll.u32 %s335_s23, 2  ;;  %v440_v14 = vld [vmem:[#allocation2] sm:$0xff] }
  0x14   : > { %s348_s27 = scalar_lea.vmem %s930_s2, %s882_s24  ;;  %s337_s30 = scalar_lea.vmem %s929_s1, %s882_s24 }
  0x15   : > { %v382_v1 = vld [vmem:[%s348_s27] sm:$0xf]  ;;  %s359_s10 = scalar_lea.vmem %s931_s3, %s882_s24  ;;  %s370_s13 = scalar_lea.vmem %s932_s4, %s882_s24 }
  0x16   : > { %v389_v2 = vsel %vm379_vm0, %v382_v1, 0  ;;  %v381_v3 = vld [vmem:[%s337_s30] sm:$0xf] }
  0x17   : > { %719 = vmatpush3.bf16.xpose.msra.mxu0 %v389_v2  ;;  %v383_v18 = vld [vmem:[%s359_s10] sm:$0xf] }
  0x18   : > { %v477_v19 = vsel %vm475_vm3, %v383_v18, 0 }
  0x19   : > { %725 = vmatpush3.bf16.msra.mxu1 %v477_v19 }
  0x1e   : > { %721 = vmatmul.mubr.msk.bf16.vlgmr.msra.gmra.mrb[0].mxu0 %vm379_vm0, %v381_v3 }
  0xf1   : > { %v425_v5 = vpop.f32.mrb[0].mxu0 }
  0xf2   : > { %v431_v7 = vmul.f32 0.35355338, %v425_v5  ;;  %v722_v8 = vpop.f32.mrb[1].mxu0 }
  0xf3   : > { %v428_v9 = vpop.f32.mrb[2].mxu0 }
  0xf4   : > { %v723_v10 = vpop.f32.mrb[3].mxu0  ;;  %v439_v11 = vadd.f32 %v710_v6, %v431_v7 }
  0xf6   : > { %v441_v12 = vsel %vm379_vm0, %v439_v11, -inf }
  0xf7   : > { %442 = vmax.xlane.f32.xlu0 %v441_v12 }
 0x184   : > { %v443_v15 = vpop.xlane.xlu0 %442 }
 0x185   : > { %v444_v16 = vmax.f32 %v440_v14, %v443_v15 }
 0x187   : > { %v445_v17 = vsub.f32 %v440_v14, %v444_v16  ;;  %521 = vst.msk [vmem:[#allocation2] sm:$0xff] %vm376_vm2, %v444_v16  ;;  %450 = vperm.xlu0 %774, %v444_v16  }
 0x189   : > { %v446_v26 = vmul.f32 1.442695, %v445_v17 }
 0x206   : > { %v451_v20 = vpop.permute.xlu0 %450 }
 0x207   : > { %v453_v21 = vsub.f32 %v439_v11, %v451_v20 }
 0x209   : > { %v454_v22 = vmul.f32 1.442695, %v453_v21 }
 0x20b   : > { %776 = vpow2.f32 %v454_v22 }
 0x20c   : > { %778 = vpow2.f32 %v446_v26 }
 0x215   : > { %v777_v23 = vpop.eup %776 }
 0x216   : > { %v458_v24 = vsel %vm379_vm0, %v777_v23, 0.0  ;;  %v471_v25 = vpack.c.bf16 %v777_v23, %v777_v23  ;;  %v779_v27 = vpop.eup %778 }
 0x217   : > { %459 = vadd.xlane.f32.xlu1 %v458_v24  ;;  %v457_v29 = vmul.f32 %v779_v27, %v456_v28 }
 0x218   : > { %727 = vmatmul.mubr.msk.bf16.vlgmr.msra.gmra.mrb[0].mxu1 %vm379_vm0, %v471_v25 }
 0x228   : > { %467 = vperm.xlu1 %775, %v779_v27  }
 0x2a4   : > { %v460_v30 = vpop.xlane.xlu1 %459 }
 0x2a5   : > { %v461_v31 = vadd.f32 %v460_v30, %v457_v29 }
 0x2a7   : > { %463 = vst.msk [vmem:[#allocation3] sm:$0xff] %vm376_vm2, %v461_v31 }
 0x2a8   : > { %v468_v35 = vpop.permute.xlu1 %467 }
 0x2a9   : > { %v470_v36 = vmul.f32 %v468_v35, %v464_v34 }
 0x2ae   : > { %v526_v32 = vld [vmem:[#allocation3] sm:$0xff] }
 0x2af   : > { %780 = vrcp.f32 %v526_v32 }
 0x2b9   : > { %v781_v33 = vpop.eup %780 }
 0x2ba   : > { %530 = vperm.xlu1 %775, %v781_v33  }
 0x2eb   : > { %v513_v37 = vpop.f32.mrb[0].mxu1 }
 0x2ec   : > { %v519_v38 = vadd.f32 %v513_v37, %v470_v36  ;;  %v728_v39 = vpop.f32.mrb[1].mxu1 }
 0x2ed   : > { %v516_v40 = vpop.f32.mrb[2].mxu1 }
 0x2ee   : > { %520 = vst.msk [vmem:[#allocation4] sm:$0xff] %vm379_vm0, %v519_v38  ;;  %v729_v41 = vpop.f32.mrb[3].mxu1 }
 0x2f5   : > { %v525_v42 = vld [vmem:[#allocation4] sm:$0xff] }
 0x339   : > { %v531_v43 = vpop.permute.xlu1 %530 }
 0x33a   : > { %v533_v44 = vmul.f32 %v531_v43, %v525_v42 }
 0x33c   : > { %v534_v45 = vpack.c.bf16 %v533_v44, %v533_v44 }
 0x33e   : > { %536 = vst.msk [vmem:[%s370_s13] sm:$0xf] %vm535_vm4, %v534_v45 }
 0x33f PF: > { %s14_s19 = sadd.s32 1, %s820_s19   ;;  %s933_s15 = smov %s812_s17 }
 0x340   : > { %p11_p7 = scmp.ge.s32.totalorder %s14_s19, 10   ;;  %s934_s16 = smov %s816_s18 }
 0x341   : > { %s935_s17 = smov %s938_s20  ;;  %s936_s18 = smov %s942_s21 }
 0x342   :  { %13 = sbr.rel (!%p11_p7) target bundleno = 3 (0x3), region = 83 }

// kernel: transformer_forward.34
= control target key start
LH: loop header
LB: loop body
LE: loop exit
PB: predicated region body
PF: predicated region fallthrough
CT: control target
= control target key end

     0   :  { %vm20_vm0 = vcmask 261120   ;;  %vm87_vm5 = vcmask 257024   ;;  %s151_s0 = inlined_call_operand.vmem [shape: bf16[16,32], index: 0, kind: input, shape index: {}]   ;;  %s152_s1 = inlined_call_operand.vmem [shape: f32[1,32], index: 1, kind: input, shape index: {}]   ;;  %s153_s2 = inlined_call_operand.vmem [shape: f32[1,32], index: 2, kind: input, shape index: {}]   ;;  %s154_s3 = inlined_call_operand.vmem [shape: bf16[16,32], index: 3, kind: output, shape index: {}]  }
   0x1   :  { %v101_v0 = vld [vmem:[%s151_s0] sm:$0xff]  }
   0x2   :  { %v102_v1 = vunpack.c.l.bf16 %v101_v0  ;;  %v103_v2 = vunpack.c.h.bf16 %v101_v0  ;;  %v94_v31 = vld [vmem:[%s152_s1] ss:$0 sm:$0xff] }
   0x3   :  { %v95_v34 = vld [vmem:[%s153_s2] ss:$0 sm:$0xff] }
   0x4   :  { %v21_v3 = vsel %vm20_vm0, %v102_v1, 0.0  ;;  %v24_v4 = vsel %vm20_vm0, %v103_v2, 0.0 }
   0x5   :  { %22 = vadd.xlane.f32.xlu0 %v21_v3 }
   0x9   :  { %25 = vadd.xlane.f32.xlu0 %v24_v4 }
  0x92   :  { %v23_v5 = vpop.xlane.xlu0 %22 }
  0x93   :  { %v28_v6 = vmul.f32 0.03125, %v23_v5 }
  0x95   :  { %v30_v7 = vsub.f32 %v102_v1, %v28_v6 }
  0x96   :  { %v26_v8 = vpop.xlane.xlu0 %25 }
  0x97   :  { %v29_v9 = vmul.f32 0.03125, %v26_v8  ;;  %v32_v10 = vmul.f32 %v30_v7, %v30_v7  ;;  %v67_v32 = vmul.f32 %v94_v31, %v30_v7 }
  0x99   :  { %v31_v11 = vsub.f32 %v103_v2, %v29_v9  ;;  %v34_v12 = vsel %vm20_vm0, %v32_v10, 0.0 }
  0x9a   :  { %35 = vadd.xlane.f32.xlu1 %v34_v12 }
  0x9b   :  { %v33_v13 = vmul.f32 %v31_v11, %v31_v11  ;;  %v68_v36 = vmul.f32 %v94_v31, %v31_v11 }
  0x9d   :  { %v37_v14 = vsel %vm20_vm0, %v33_v13, 0.0 }
  0x9e   :  { %38 = vadd.xlane.f32.xlu1 %v37_v14 }
 0x127   :  { %v36_v15 = vpop.xlane.xlu1 %35 }
 0x128   :  { %v41_v16 = vmul.f32 0.032258064, %v36_v15 }
 0x12a   :  { %104 = vrsqrt.f32 %v41_v16  ;;  %vm45_vm1 = vcmp.eq.f32.partialorder %v41_v16, inf  ;;  %v48_v21 = vand.u32 2147483648, %v41_v16  ;;  %vm47_vm2 = vcmp.eq.f32.partialorder %v41_v16, 0.0 }
 0x12b   :  { %v39_v17 = vpop.xlane.xlu1 %38 }
 0x12c   :  { %v42_v18 = vmul.f32 0.032258064, %v39_v17 }
 0x12e   :  { %106 = vrsqrt.f32 %v42_v18  ;;  %vm52_vm3 = vcmp.eq.f32.partialorder %v42_v18, inf  ;;  %v55_v27 = vand.u32 2147483648, %v42_v18  ;;  %vm54_vm4 = vcmp.eq.f32.partialorder %v42_v18, 0.0 }
 0x134   :  { %v105_v19 = vpop.eup %104 }
 0x135   :  { %v44_v20 = vmul.f32 %v105_v19, %v41_v16 }
 0x137   :  { %v46_v22 = vsel %vm45_vm1, %v41_v16, %v44_v20 }
 0x138   :  { %v107_v23 = vpop.eup %106  ;;  %v49_v24 = vsel %vm47_vm2, %v48_v21, %v46_v22 }
 0x139   :  { %v57_v25 = vadd.f32 1e-06, %v49_v24  ;;  %v51_v26 = vmul.f32 %v107_v23, %v42_v18 }
 0x13b   :  { %108 = vrcp.f32 %v57_v25  ;;  %v53_v28 = vsel %vm52_vm3, %v42_v18, %v51_v26 }
 0x13c   :  { %v56_v29 = vsel %vm54_vm4, %v55_v27, %v53_v28 }
 0x13d   :  { %v58_v30 = vadd.f32 1e-06, %v56_v29 }
 0x13f   :  { %110 = vrcp.f32 %v58_v30 }
 0x145   :  { %v109_v33 = vpop.eup %108 }
 0x146   :  { %v69_v35 = vmul.f32 %v109_v33, %v67_v32 }
 0x148   :  { %v77_v37 = vadd.f32 %v95_v34, %v69_v35 }
 0x149   :  { %v111_v38 = vpop.eup %110 }
 0x14a   :  { %v98_v39 = vpack.c.bf16 %v77_v37, %v77_v37  ;;  %v70_v40 = vmul.f32 %v111_v38, %v68_v36 }
 0x14c   :  { %88 = vst.msk [vmem:[%s154_s3] sm:$0xf] %vm87_vm5, %v98_v39  ;;  %v78_v41 = vadd.f32 %v95_v34, %v70_v40 }
 0x14e   :  { %v99_v42 = vpack.c.bf16 %v78_v41, %v78_v41 }
 0x150   :  { %89 = vst.msk [vmem:[%s154_s3 + $0x4] sm:$0xf] %vm87_vm5, %v99_v42 }

// kernel: transformer_forward.29
= control target key start
LH: loop header
LB: loop body
LE: loop exit
PB: predicated region body
PF: predicated region fallthrough
CT: control target
= control target key end

     0   :  { %vm34_vm0 = vcmask 261120   ;;  %v408_v16 = vmov 0.0   ;;  %vm409_vm1 = vmmov 0   ;;  %vm314_vm6 = vcmask 257024   ;;  %s543_s0 = inlined_call_operand.vmem [shape: bf16[16,32], index: 0, kind: input, shape index: {}, may-alias: {0,7}]   ;;  %s544_s3 = inlined_call_operand.vmem [shape: bf16[32,128], index: 3, kind: input, shape index: {}]   ;;  %s545_s5 = inlined_call_operand.vmem [shape: bf16[128,32], index: 5, kind: input, shape index: {}]   ;;  %s546_s1 = inlined_call_operand.vmem [shape: f32[1,32], index: 1, kind: input, shape index: {}]   ;;  %s547_s2 = inlined_call_operand.vmem [shape: f32[1,32], index: 2, kind: input, shape index: {}]   ;;  %s548_s4 = inlined_call_operand.vmem [shape: f32[1,128], index: 4, kind: input, shape index: {}]   ;;  %s549_s7 = inlined_call_operand.vmem [shape: bf16[16,32], index: 7, kind: input, shape index: {}, may-alias: {0,7}]   ;;  %s550_s6 = inlined_call_operand.vmem [shape: f32[1,32], index: 6, kind: input, shape index: {}]   ;;  %s551_s8 = inlined_call_operand.vmem [shape: bf16[16,32], index: 8, kind: output, shape index: {}]  }
   0x1   :  { %v341_v0 = vld [vmem:[%s543_s0] sm:$0xff]   ;;  %360 = vmatprep.subr.bf16.mxu0 %v408_v16  ;;  %35 = vst.msk [vmem:[#allocation2] sm:$0xff] %vm34_vm0, %v408_v16  ;;  %36 = vst.msk [vmem:[#allocation2 + $0x8] sm:$0xff] %vm34_vm0, %v408_v16  ;;  %368 = vmatprep.subr.bf16.mxu1 %v408_v16  ;;  %v391_v17 = vld [vmem:[%s544_s3 + $0x8] sm:$0xff]  }
   0x2   :  { %v342_v1 = vunpack.c.l.bf16 %v341_v0  ;;  %v343_v2 = vunpack.c.h.bf16 %v341_v0  ;;  %v390_v15 = vld [vmem:[%s544_s3] sm:$0xff]   ;;  %364 = vmatprep.mubr.msk.bf16.mxu0 %vm409_vm1, %v408_v16  ;;  %384 = vmatprep.mubr.msk.bf16.mxu1 %vm409_vm1, %v408_v16  ;;  %v393_v19 = vld [vmem:[%s545_s5 + $0x8] sm:$0xff]   ;;  %v394_v20 = vld [vmem:[%s545_s5 + $0x10] sm:$0xff]  }
   0x3   :  { %361 = vmatpush3.bf16.msra.mxu0 %v390_v15  ;;  %v392_v18 = vld [vmem:[%s545_s5] sm:$0xff]   ;;  %v395_v21 = vld [vmem:[%s545_s5 + $0x18] sm:$0xff]   ;;  %v397_v23 = vld [vmem:[%s545_s5 + $0x28] sm:$0xff]  }
   0x4   :  { %v43_v3 = vsel %vm34_vm0, %v342_v1, 0.0  ;;  %v46_v4 = vsel %vm34_vm0, %v343_v2, 0.0  ;;  %362 = vmatprep.subr.bf16.mxu0 %v408_v16  ;;  %369 = vmatpush3.bf16.msra.mxu1 %v392_v18  ;;  %v396_v22 = vld [vmem:[%s545_s5 + $0x20] sm:$0xff]   ;;  %v398_v52 = vld [vmem:[%s545_s5 + $0x30] sm:$0xff]   ;;  %v399_v53 = vld [vmem:[%s545_s5 + $0x38] sm:$0xff]  }
   0x5   :  { %44 = vadd.xlane.f32.xlu0 %v43_v3  ;;  %370 = vmatprep.subr.bf16.mxu1 %v408_v16  ;;  %v321_v40 = vld [vmem:[%s546_s1] ss:$0 sm:$0xff] }
   0x6   :  { %v322_v46 = vld [vmem:[%s547_s2] ss:$0 sm:$0xff] }
   0x7   :  { %363 = vmatpush3.bf16.msra.mxu0 %v391_v17  ;;  %v323_v54 = vld [vmem:[%s548_s4] ss:$0 sm:$0xff] }
   0x8   :  { %371 = vmatpush3.bf16.msra.mxu1 %v393_v19  ;;  %v174_v0 = vld [vmem:[#allocation2] sm:$0xff] }
   0x9   :  { %47 = vadd.xlane.f32.xlu0 %v46_v4  ;;  %372 = vmatprep.subr.bf16.mxu1 %v408_v16 }
   0xc   :  { %373 = vmatpush3.bf16.msra.mxu1 %v394_v20 }
   0xd   :  { %374 = vmatprep.subr.bf16.mxu1 %v408_v16 }
  0x10   :  { %375 = vmatpush3.bf16.msra.mxu1 %v395_v21 }
  0x11   :  { %376 = vmatprep.subr.bf16.mxu1 %v408_v16 }
  0x14   :  { %377 = vmatpush3.bf16.msra.mxu1 %v396_v22 }
  0x15   :  { %378 = vmatprep.subr.bf16.mxu1 %v408_v16 }
  0x18   :  { %379 = vmatpush3.bf16.msra.mxu1 %v397_v23 }
  0x19   :  { %380 = vmatprep.subr.bf16.mxu1 %v408_v16 }
  0x1c   :  { %381 = vmatpush3.bf16.msra.mxu1 %v398_v52 }
  0x1d   :  { %382 = vmatprep.subr.bf16.mxu1 %v408_v16 }
  0x20   :  { %383 = vmatpush3.bf16.msra.mxu1 %v399_v53 }
  0x92   :  { %v45_v5 = vpop.xlane.xlu0 %44 }
  0x93   :  { %v50_v6 = vmul.f32 0.03125, %v45_v5 }
  0x95   :  { %v460_v7 = vsub.f32 %v342_v1, %v50_v6 }
  0x96   :  { %v48_v8 = vpop.xlane.xlu0 %47 }
  0x97   :  { %v51_v9 = vmul.f32 0.03125, %v48_v8  ;;  %v54_v10 = vmul.f32 %v460_v7, %v460_v7  ;;  %v89_v42 = vmul.f32 %v321_v40, %v460_v7  ;;  %v345_v8 = vld [vmem:[%s549_s7] sm:$0xff]  }
  0x99   :  { %v464_v11 = vsub.f32 %v343_v2, %v51_v9  ;;  %v56_v12 = vsel %vm34_vm0, %v54_v10, 0.0  ;;  %v175_v2 = vld [vmem:[#allocation2 + $0x8] sm:$0xff]  ;;  %v335_v9 = vld [vmem:[%s550_s6] ss:$0 sm:$0xff]  ;;  %v346_v10 = vunpack.c.l.bf16 %v345_v8 }
  0x9a   :  { %57 = vadd.xlane.f32.xlu1 %v56_v12 }
  0x9b   :  { %v55_v13 = vmul.f32 %v464_v11, %v464_v11  ;;  %v90_v43 = vmul.f32 %v321_v40, %v464_v11 }
  0x9d   :  { %v59_v14 = vsel %vm34_vm0, %v55_v13, 0.0  ;;  %v347_v13 = vunpack.c.h.bf16 %v345_v8 }
  0x9e   :  { %60 = vadd.xlane.f32.xlu1 %v59_v14 }
 0x127   :  { %v58_v24 = vpop.xlane.xlu1 %57 }
 0x128   :  { %v63_v25 = vmul.f32 0.032258064, %v58_v24 }
 0x12a   :  { %400 = vrsqrt.f32 %v63_v25  ;;  %vm67_vm2 = vcmp.eq.f32.partialorder %v63_v25, inf  ;;  %v70_v30 = vand.u32 2147483648, %v63_v25  ;;  %vm69_vm3 = vcmp.eq.f32.partialorder %v63_v25, 0.0 }
 0x12b   :  { %v61_v26 = vpop.xlane.xlu1 %60 }
 0x12c   :  { %v64_v27 = vmul.f32 0.032258064, %v61_v26 }
 0x12e   :  { %402 = vrsqrt.f32 %v64_v27  ;;  %vm74_vm4 = vcmp.eq.f32.partialorder %v64_v27, inf  ;;  %v77_v36 = vand.u32 2147483648, %v64_v27  ;;  %vm76_vm5 = vcmp.eq.f32.partialorder %v64_v27, 0.0 }
 0x134   :  { %v401_v28 = vpop.eup %400 }
 0x135   :  { %v66_v29 = vmul.f32 %v401_v28, %v63_v25 }
 0x137   :  { %v68_v31 = vsel %vm67_vm2, %v63_v25, %v66_v29 }
 0x138   :  { %v403_v32 = vpop.eup %402  ;;  %v71_v33 = vsel %vm69_vm3, %v70_v30, %v68_v31 }
 0x139   :  { %v79_v34 = vadd.f32 1e-06, %v71_v33  ;;  %v73_v35 = vmul.f32 %v403_v32, %v64_v27 }
 0x13b   :  { %404 = vrcp.f32 %v79_v34  ;;  %v75_v37 = vsel %vm74_vm4, %v64_v27, %v73_v35 }
 0x13c   :  { %v78_v38 = vsel %vm76_vm5, %v77_v36, %v75_v37 }
 0x13d   :  { %v80_v39 = vadd.f32 1e-06, %v78_v38 }
 0x13f   :  { %406 = vrcp.f32 %v80_v39 }
 0x145   :  { %v405_v41 = vpop.eup %404 }
 0x146   :  { %v91_v44 = vmul.f32 %v405_v41, %v89_v42 }
 0x148   :  { %v99_v48 = vadd.f32 %v322_v46, %v91_v44 }
 0x149   :  { %v407_v45 = vpop.eup %406 }
 0x14a   :  { %v92_v47 = vmul.f32 %v407_v45, %v90_v43 }
 0x14c   :  { %v100_v49 = vadd.f32 %v322_v46, %v92_v47 }
 0x14e   :  { %v101_v50 = vpack.c.bf16 %v100_v49, %v99_v48 }
 0x150   :  { %102 = vst.msk [vmem:[#allocation3] sm:$0xff] %vm34_vm0, %v101_v50 }
 0x157   :  { %v103_v51 = vld [vmem:[#allocation3] sm:$0xff] }
 0x158   :  { %365 = vmatmul.mubr.msk.bf16.vlgmr.msra.gmra.mrb[0].mxu0 %vm34_vm0, %v103_v51 }
 0x22b   :  { %v165_v55 = vpop.f32.mrb[0].mxu0 }
 0x22c   :  { %v166_v56 = vadd.f32 %v323_v54, %v165_v55  ;;  %v366_v57 = vpop.f32.mrb[1].mxu0 }
 0x22d   :  { %v168_v58 = vpop.f32.mrb[2].mxu0 }
 0x22e   :  { %v169_v59 = vadd.f32 %v323_v54, %v168_v58  ;;  %v367_v60 = vpop.f32.mrb[3].mxu0  ;;  %v172_v61 = vmax.f32 %v166_v56, 0.0 }
 0x230   :  { %v173_v62 = vmax.f32 %v169_v59, 0.0 }
 0x232   :  { %v176_v63 = vpack.c.bf16 %v173_v62, %v172_v61 }
 0x234   :  { %385 = vmatmul.mubr.bf16.vlgmr.msra.gmra.mrb[0].mxu1 %v176_v63 }
 0x307   :  { %v275_v1 = vpop.f32.mrb[0].mxu1 }
 0x308   :  { %v282_v3 = vadd.f32 %v275_v1, %v174_v0  ;;  %v386_v4 = vpop.f32.mrb[1].mxu1 }
 0x309   :  { %v278_v5 = vpop.f32.mrb[2].mxu1 }
 0x30a   :  { %284 = vst.msk [vmem:[#allocation2] sm:$0xff] %vm34_vm0, %v282_v3  ;;  %v283_v6 = vadd.f32 %v278_v5, %v175_v2  ;;  %v387_v7 = vpop.f32.mrb[3].mxu1 }
 0x30c   :  { %285 = vst.msk [vmem:[#allocation2 + $0x8] sm:$0xff] %vm34_vm0, %v283_v6 }
 0x311   :  { %v289_v11 = vld [vmem:[#allocation2] sm:$0xff] }
 0x312   :  { %v298_v12 = vadd.f32 %v335_v9, %v289_v11 }
 0x313   :  { %v290_v14 = vld [vmem:[#allocation2 + $0x8] sm:$0xff] }
 0x314   :  { %v304_v15 = vadd.f32 %v346_v10, %v298_v12  ;;  %v299_v16 = vadd.f32 %v335_v9, %v290_v14 }
 0x316   :  { %v338_v17 = vpack.c.bf16 %v304_v15, %v304_v15  ;;  %v305_v18 = vadd.f32 %v347_v13, %v299_v16 }
 0x318   :  { %315 = vst.msk [vmem:[%s551_s8] sm:$0xf] %vm314_vm6, %v338_v17  ;;  %v339_v19 = vpack.c.bf16 %v305_v18, %v305_v18 }
 0x31a   :  { %316 = vst.msk [vmem:[%s551_s8 + $0x4] sm:$0xf] %vm314_vm6, %v339_v19 }

// kernel: transformer_forward.39
= control target key start
LH: loop header
LB: loop body
LE: loop exit
PB: predicated region body
PF: predicated region fallthrough
CT: control target
= control target key end

     0   :  { %v134_v0 = vmov 0.0   ;;  %vm135_vm0 = vmmov 0   ;;  %vm45_vm1 = vcmask 261120   ;;  %s171_s1 = inlined_call_operand.vmem [shape: bf16[32,128], index: 1, kind: input, shape index: {}]   ;;  %s172_s0 = inlined_call_operand.vmem [shape: bf16[16,32], index: 0, kind: input, shape index: {}]   ;;  %s173_s2 = inlined_call_operand.vmem [shape: f32[1,128], index: 2, kind: input, shape index: {}]   ;;  %s174_s3 = inlined_call_operand.vmem [shape: bf16[16,128], index: 3, kind: output, shape index: {}]  }
   0x1   :  { %121 = vmatprep.subr.bf16.mxu0 %v134_v0  ;;  %v131_v1 = vld [vmem:[%s171_s1] sm:$0xff]   ;;  %125 = vmatprep.mubr.msk.bf16.mxu0 %vm135_vm0, %v134_v0  ;;  %v132_v2 = vld [vmem:[%s171_s1 + $0x8] sm:$0xff]  }
   0x2   :  { %122 = vmatpush3.bf16.msra.mxu0 %v131_v1  ;;  %v133_v3 = vld [vmem:[%s172_s0] sm:$0xff]  }
   0x3   :  { %123 = vmatprep.subr.bf16.mxu0 %v134_v0  ;;  %v104_v4 = vld [vmem:[%s173_s2] ss:$0 sm:$0xff] }
   0x6   :  { %124 = vmatpush3.bf16.msra.mxu0 %v132_v2 }
   0x9   :  { %126 = vmatmul.mubr.msk.bf16.vlgmr.msra.gmra.mrb[0].mxu0 %vm45_vm1, %v133_v3 }
  0xdc   :  { %v83_v5 = vpop.f32.mrb[0].mxu0 }
  0xdd   :  { %v127_v6 = vpop.f32.mrb[1].mxu0  ;;  %v84_v8 = vadd.f32 %v104_v4, %v83_v5 }
  0xde   :  { %v86_v7 = vpop.f32.mrb[2].mxu0 }
  0xdf   :  { %v87_v9 = vadd.f32 %v104_v4, %v86_v7  ;;  %v128_v10 = vpop.f32.mrb[3].mxu0 }
  0xe1   :  { %v116_v11 = vpack.c.bf16 %v87_v9, %v84_v8 }
  0xe3   :  { %117 = vst [vmem:[%s174_s3] sm:$0xff] %v116_v11  }

// kernel: transformer_forward.51
= control target key start
LH: loop header
LB: loop body
LE: loop exit
PB: predicated region body
PF: predicated region fallthrough
CT: control target
= control target key end

     0   :  { %vm31_vm0 = vcmask 261120   ;;  %v200_v16 = vmov 0.0   ;;  %vm201_vm1 = vmmov 0   ;;  %s262_s0 = inlined_call_operand.vmem [shape: bf16[16,32], index: 0, kind: input, shape index: {}]   ;;  %s263_s3 = inlined_call_operand.vmem [shape: bf16[32,128], index: 3, kind: input, shape index: {}]   ;;  %s264_s1 = inlined_call_operand.vmem [shape: f32[1,32], index: 1, kind: input, shape index: {}]   ;;  %s265_s2 = inlined_call_operand.vmem [shape: f32[1,32], index: 2, kind: input, shape index: {}]   ;;  %s266_s4 = inlined_call_operand.vmem [shape: f32[1,128], index: 4, kind: input, shape index: {}]   ;;  %s267_s5 = inlined_call_operand.vmem [shape: f32[16,128], index: 5, kind: output, shape index: {}]  }
   0x1   :  { %v174_v0 = vld [vmem:[%s262_s0] sm:$0xff]   ;;  %180 = vmatprep.subr.bf16.mxu0 %v200_v16  ;;  %v191_v17 = vld [vmem:[%s263_s3 + $0x8] sm:$0xff]   ;;  %184 = vmatprep.mubr.msk.bf16.mxu0 %vm201_vm1, %v200_v16 }
   0x2   :  { %v175_v1 = vunpack.c.l.bf16 %v174_v0  ;;  %v176_v2 = vunpack.c.h.bf16 %v174_v0  ;;  %v190_v15 = vld [vmem:[%s263_s3] sm:$0xff]  }
   0x3   :  { %181 = vmatpush3.bf16.msra.mxu0 %v190_v15  ;;  %v167_v34 = vld [vmem:[%s264_s1] ss:$0 sm:$0xff] }
   0x4   :  { %v32_v3 = vsel %vm31_vm0, %v175_v1, 0.0  ;;  %v35_v4 = vsel %vm31_vm0, %v176_v2, 0.0  ;;  %182 = vmatprep.subr.bf16.mxu0 %v200_v16  ;;  %v168_v40 = vld [vmem:[%s265_s2] ss:$0 sm:$0xff] }
   0x5   :  { %33 = vadd.xlane.f32.xlu0 %v32_v3  ;;  %v169_v46 = vld [vmem:[%s266_s4] ss:$0 sm:$0xff] }
   0x7   :  { %183 = vmatpush3.bf16.msra.mxu0 %v191_v17 }
   0x9   :  { %36 = vadd.xlane.f32.xlu0 %v35_v4 }
  0x92   :  { %v34_v5 = vpop.xlane.xlu0 %33 }
  0x93   :  { %v39_v6 = vmul.f32 0.03125, %v34_v5 }
  0x95   :  { %v41_v7 = vsub.f32 %v175_v1, %v39_v6 }
  0x96   :  { %v37_v8 = vpop.xlane.xlu0 %36 }
  0x97   :  { %v40_v9 = vmul.f32 0.03125, %v37_v8  ;;  %v43_v10 = vmul.f32 %v41_v7, %v41_v7  ;;  %v78_v36 = vmul.f32 %v167_v34, %v41_v7 }
  0x99   :  { %v42_v11 = vsub.f32 %v176_v2, %v40_v9  ;;  %v45_v12 = vsel %vm31_vm0, %v43_v10, 0.0 }
  0x9a   :  { %46 = vadd.xlane.f32.xlu1 %v45_v12 }
  0x9b   :  { %v44_v13 = vmul.f32 %v42_v11, %v42_v11  ;;  %v79_v37 = vmul.f32 %v167_v34, %v42_v11 }
  0x9d   :  { %v48_v14 = vsel %vm31_vm0, %v44_v13, 0.0 }
  0x9e   :  { %49 = vadd.xlane.f32.xlu1 %v48_v14 }
 0x127   :  { %v47_v18 = vpop.xlane.xlu1 %46 }
 0x128   :  { %v52_v19 = vmul.f32 0.032258064, %v47_v18 }
 0x12a   :  { %192 = vrsqrt.f32 %v52_v19  ;;  %vm56_vm2 = vcmp.eq.f32.partialorder %v52_v19, inf  ;;  %v59_v24 = vand.u32 2147483648, %v52_v19  ;;  %vm58_vm3 = vcmp.eq.f32.partialorder %v52_v19, 0.0 }
 0x12b   :  { %v50_v20 = vpop.xlane.xlu1 %49 }
 0x12c   :  { %v53_v21 = vmul.f32 0.032258064, %v50_v20 }
 0x12e   :  { %194 = vrsqrt.f32 %v53_v21  ;;  %vm63_vm4 = vcmp.eq.f32.partialorder %v53_v21, inf  ;;  %v66_v30 = vand.u32 2147483648, %v53_v21  ;;  %vm65_vm5 = vcmp.eq.f32.partialorder %v53_v21, 0.0 }
 0x134   :  { %v193_v22 = vpop.eup %192 }
 0x135   :  { %v55_v23 = vmul.f32 %v193_v22, %v52_v19 }
 0x137   :  { %v57_v25 = vsel %vm56_vm2, %v52_v19, %v55_v23 }
 0x138   :  { %v195_v26 = vpop.eup %194  ;;  %v60_v27 = vsel %vm58_vm3, %v59_v24, %v57_v25 }
 0x139   :  { %v68_v28 = vadd.f32 1e-06, %v60_v27  ;;  %v62_v29 = vmul.f32 %v195_v26, %v53_v21 }
 0x13b   :  { %196 = vrcp.f32 %v68_v28  ;;  %v64_v31 = vsel %vm63_vm4, %v53_v21, %v62_v29 }
 0x13c   :  { %v67_v32 = vsel %vm65_vm5, %v66_v30, %v64_v31 }
 0x13d   :  { %v69_v33 = vadd.f32 1e-06, %v67_v32 }
 0x13f   :  { %198 = vrcp.f32 %v69_v33 }
 0x145   :  { %v197_v35 = vpop.eup %196 }
 0x146   :  { %v80_v38 = vmul.f32 %v197_v35, %v78_v36 }
 0x148   :  { %v88_v42 = vadd.f32 %v168_v40, %v80_v38 }
 0x149   :  { %v199_v39 = vpop.eup %198 }
 0x14a   :  { %v81_v41 = vmul.f32 %v199_v39, %v79_v37 }
 0x14c   :  { %v89_v43 = vadd.f32 %v168_v40, %v81_v41 }
 0x14e   :  { %v90_v44 = vpack.c.bf16 %v89_v43, %v88_v42 }
 0x150   :  { %91 = vst.msk [vmem:[#allocation2] sm:$0xff] %vm31_vm0, %v90_v44 }
 0x157   :  { %v92_v45 = vld [vmem:[#allocation2] sm:$0xff] }
 0x158   :  { %185 = vmatmul.mubr.msk.bf16.vlgmr.msra.gmra.mrb[0].mxu0 %vm31_vm0, %v92_v45 }
 0x22b   :  { %v154_v47 = vpop.f32.mrb[0].mxu0 }
 0x22c   :  { %v155_v48 = vadd.f32 %v169_v46, %v154_v47  ;;  %v186_v49 = vpop.f32.mrb[1].mxu0 }
 0x22d   :  { %v157_v50 = vpop.f32.mrb[2].mxu0 }
 0x22e   :  { %161 = vst [vmem:[%s267_s5] sm:$0xff] %v155_v48  ;;  %v158_v51 = vadd.f32 %v169_v46, %v157_v50  ;;  %v187_v52 = vpop.f32.mrb[3].mxu0 }
 0x230   :  { %162 = vst [vmem:[%s267_s5 + $0x8] sm:$0xff] %v158_v51 }

</bundles_post_ra>
